<compile_context>
chip_gen: v5e
topology: v5e:2x2
jax: 0.10.0
libtpu: 0.0.40
codegen_flags: <defaults>
</compile_context>

<pallas_src>
import functools

import jax
import jax.numpy as jnp
import numpy as np
from jax.experimental import pallas as pl
from jax.experimental.pallas import tpu as pltpu

EPS = 1e-8            # F.cosine_similarity default eps
EPS2 = EPS * EPS


# ------------------------------------------------------------------
# Fused kernel: two-head MLP + get_loss hot path (velocities, neighbor
# cosine, best-neighbor, open/close cosine loss)
# ------------------------------------------------------------------
def _fused_kernel(cus_ref, cusg_ref,
                  w1_ref, b1_ref, w2_ref, b2_ref, w3_ref, b3_ref,
                  w4_ref, b4_ref, scale_ref,
                  out_ref, *, warm, n_total):
    i = pl.program_id(0)
    x = cus_ref[...]                       # (3, tile_n), rows = [c, u, s]
    tile_n = x.shape[1]

    # ---- fused two-head MLP, transposed orientation (cells on lanes) ----
    h = jnp.maximum(jnp.dot(w1_ref[...], x, preferred_element_type=jnp.float32) + b1_ref[...], 0.0)
    h = jnp.maximum(jnp.dot(w2_ref[...], h, preferred_element_type=jnp.float32) + b2_ref[...], 0.0)
    h = jnp.maximum(jnp.dot(w3_ref[...], h, preferred_element_type=jnp.float32) + b3_ref[...], 0.0)
    out4 = jax.nn.sigmoid(jnp.dot(w4_ref[...], h, preferred_element_type=jnp.float32) + b4_ref[...])
    # scale rows by [alpha0, 1, gamma0, 1]  -> rows = [alpha, beta, gamma, alpha_c]
    out4 = out4 * scale_ref[...]

    c = x[0:1, :]
    u = x[1:2, :]
    s = x[2:3, :]
    alpha = out4[0:1, :]
    beta = out4[1:2, :]
    gamma = out4[2:3, :]
    alpha_c = out4[3:4, :]

    vcopen = alpha_c * (1.0 - c)
    vcclose = alpha_c * (-c)
    vu = alpha * c - beta * u
    vs = beta * u - gamma * s

    if warm:
        # direction == 'complete': clamp by sign depending on u < s
        m = u < s
        vu = jnp.where(m, jnp.minimum(vu, 0.0), jnp.maximum(vu, 0.0))
        vs = jnp.where(m, jnp.minimum(vs, 0.0), jnp.maximum(vs, 0.0))

    # neighbor deltas computed in-kernel from the packed gathered slab
    cusg = cusg_ref[...]                   # (3, K, tile_n)
    cnv = cusg[0] - c
    unv = cusg[1] - u
    snv = cusg[2] - s
    K = cnv.shape[0]

    # 2-D cosine similarity between neighbor delta (unv, snv) and (vu, vs)
    vus2 = vu * vu + vs * vs                               # hoisted, reused below
    dot2 = unv * vu + snv * vs                             # (K, tile_n)
    n2_nbr = unv * unv + snv * snv
    cosine = dot2 * jax.lax.rsqrt(jnp.maximum(n2_nbr * vus2, EPS2))

    # first-occurrence argmax over the neighbor (sublane) axis
    j_iota = jax.lax.broadcasted_iota(jnp.int32, cosine.shape, 0)
    cmax = jnp.max(cosine, axis=0, keepdims=True)
    cand = jnp.where(cosine >= cmax, j_iota, jnp.int32(K))
    best = jnp.min(cand, axis=0, keepdims=True)            # (1, tile_n)
    sel = (j_iota == best).astype(jnp.float32)             # one-hot (K, tile_n)

    cnv_b = jnp.sum(sel * cnv, axis=0, keepdims=True)
    unv_b = jnp.sum(sel * unv, axis=0, keepdims=True)
    snv_b = jnp.sum(sel * snv, axis=0, keepdims=True)
    nv_norm2 = cnv_b * cnv_b + unv_b * unv_b + snv_b * snv_b
    d_us = unv_b * vu + snv_b * vs                          # shared dot part

    def one_minus_cos(vc_):
        d = cnv_b * vc_ + d_us
        vn2 = vc_ * vc_ + vus2
        return 1.0 - d * jax.lax.rsqrt(jnp.maximum(nv_norm2 * vn2, EPS2))

    cos1 = one_minus_cos(vcopen)
    cos2 = one_minus_cos(vcclose)
    vc_sel = jnp.where(cos1 <= cos2, vcopen, vcclose)       # torch.min picks first on tie

    if warm:
        per_cell = (cos1 + cos2) * 0.5
    else:
        per_cell = jnp.minimum(cos1, cos2)

    # mask padded lanes so they don't contribute to the loss sum
    lane = jax.lax.broadcasted_iota(jnp.int32, (1, tile_n), 1)
    valid = ((i * tile_n + lane) < n_total).astype(jnp.float32)
    per_cell = per_cell * valid

    # one lane-dense (8, tile_n) store:
    # rows = [vu, vs, vc_sel, alpha, beta, gamma, alpha_c, per_cell_loss]
    out_ref[...] = jnp.concatenate([vu, vs, vc_sel, out4, per_cell], axis=0)


# ------------------------------------------------------------------
# Kernel 2: vc neighbor-mean + on/off states
# ------------------------------------------------------------------
def _vcmean_kernel(vcg_ref, out_ref):
    vc = jnp.mean(vcg_ref[...], axis=0, keepdims=True)       # (1, tile_n)
    on = (vc >= 0.0).astype(jnp.float32)
    off = (vc < 0.0).astype(jnp.float32)
    out_ref[...] = jnp.concatenate([vc, on, off], axis=0)     # (3, tile_n)


# ------------------------------------------------------------------
# Weight fusion: concat layer-1, block-diagonal layers 2-4, transposed
# ------------------------------------------------------------------
def fuse_params(params):
    (wp1, bp1), (wp2, bp2), (wp3, bp3), (wp4, bp4) = params["param"]
    (wc1, bc1), (wc2, bc2), (wc3, bc3), (wc4, bc4) = params["param_c"]

    def bd(a, b):  # block-diagonal of two 2-D mats
        z1 = jnp.zeros((a.shape[0], b.shape[1]), a.dtype)
        z2 = jnp.zeros((b.shape[0], a.shape[1]), a.dtype)
        return jnp.concatenate(
            [jnp.concatenate([a, z1], axis=1),
             jnp.concatenate([z2, b], axis=1)], axis=0)

    w1t = jnp.concatenate([wp1.T, wc1.T], axis=0)             # (128, 3)
    b1 = jnp.concatenate([bp1, bc1], axis=1).T                # (128, 1)
    w2t = bd(wp2.T, wc2.T)                                    # (96, 128)
    b2 = jnp.concatenate([bp2, bc2], axis=1).T                # (96, 1)
    w3t = bd(wp3.T, wc3.T)                                    # (64, 96)
    b3 = jnp.concatenate([bp3, bc3], axis=1).T                # (64, 1)
    w4t = bd(wp4.T, wc4.T)                                    # (4, 64)  rows=[alpha,beta,gamma,alpha_c]
    b4 = jnp.concatenate([bp4, bc4], axis=1).T                # (4, 1)
    return w1t, b1, w2t, b2, w3t, b3, w4t, b4


def _full_spec(arr):
    nd = arr.ndim
    return pl.BlockSpec(arr.shape, lambda i, nd=nd: (0,) * nd)


# ------------------------------------------------------------------
# Forward wrapper (mirrors DNN_layer.forward, rna_only=False, 'complete')
# ------------------------------------------------------------------
def dnn_layer_forward(c, u, s, indices, params, alpha0, gamma0, epoch, max_tile=1024):
    n = int(c.shape[0])
    K = int(indices.shape[1]) - 1
    warm = not (epoch > 20)

    # self.alpha0.data.clamp_(1.0, 10.0); self.gamma0.data.clamp_(0.5, 1.0)
    alpha0 = jnp.clip(jnp.float32(alpha0), 1.0, 10.0)
    gamma0 = jnp.clip(jnp.float32(gamma0), 0.5, 1.0)
    scale4 = jnp.stack([alpha0, jnp.float32(1.0), gamma0, jnp.float32(1.0)]).reshape(4, 1)

    # tile sizing: multiple of 128, large by default, padded tail masked in-kernel
    n128 = ((n + 127) // 128) * 128
    tile_n = int(min(max_tile, n128))
    n_pad = ((n + tile_n - 1) // tile_n) * tile_n
    pad = n_pad - n

    x3 = jnp.stack([c, u, s], axis=0).astype(jnp.float32)      # (3, n)
    indices_ = indices[:, 1:].T                                 # (K, n)
    cusg = x3[:, indices_]                                      # one fused gather -> (3, K, n)

    if pad:
        x3p = jnp.pad(x3, ((0, 0), (0, pad)))
        cusgp = jnp.pad(cusg, ((0, 0), (0, 0), (0, pad)))
    else:
        x3p, cusgp = x3, cusg

    weights = fuse_params(params)                               # w1t,b1,...,w4t,b4

    grid = (n_pad // tile_n,)
    big = pl.pallas_call(
        functools.partial(_fused_kernel, warm=warm, n_total=n),
        out_shape=jax.ShapeDtypeStruct((8, n_pad), jnp.float32),
        grid_spec=pltpu.PrefetchScalarGridSpec(
            num_scalar_prefetch=0, grid=grid,
            in_specs=[pl.BlockSpec((3, tile_n), lambda i: (0, i)),
                      pl.BlockSpec((3, K, tile_n), lambda i: (0, 0, i))]
                     + [_full_spec(w) for w in weights]
                     + [_full_spec(scale4)],
            out_specs=pl.BlockSpec((8, tile_n), lambda i: (0, i))),
        compiler_params=pltpu.CompilerParams(dimension_semantics=("parallel",)),
    )(x3p, cusgp, *weights, scale4)

    vu = big[0, :n]
    vs = big[1, :n]
    vc_sel = big[2, :n]
    alpha = big[3, :n]
    beta = big[4, :n]
    gamma = big[5, :n]
    alpha_c = big[6, :n]
    loss = jnp.sum(big[7]) * (1.0 / n)          # padded lanes contribute exactly 0

    # vc = vc[indices_]; vc = mean(vc, dim=0)  — gather is JAX glue, mean in kernel
    vcg = vc_sel[indices_]                                      # (K, n)
    if pad:
        vcg = jnp.pad(vcg, ((0, 0), (0, pad)))

    out3 = pl.pallas_call(
        _vcmean_kernel,
        out_shape=jax.ShapeDtypeStruct((3, n_pad), jnp.float32),
        grid_spec=pltpu.PrefetchScalarGridSpec(
            num_scalar_prefetch=0, grid=grid,
            in_specs=[pl.BlockSpec((K, tile_n), lambda i: (0, i))],
            out_specs=pl.BlockSpec((3, tile_n), lambda i: (0, i))),
        compiler_params=pltpu.CompilerParams(dimension_semantics=("parallel",)),
    )(vcg)
    vc = out3[0, :n]
    stateon = out3[1, :n]
    stateoff = out3[2, :n]

    return loss, vc, vu, vs, alpha_c, alpha, beta, gamma, (stateon, stateoff)


# ------------------------------------------------------------------
# Deterministic parameter init (PyTorch nn.Linear default-style uniform)
# ------------------------------------------------------------------
def init_linear(key, fan_in, fan_out):
    kw, kb = jax.random.split(key)
    bound = 1.0 / np.sqrt(fan_in)
    w = jax.random.uniform(kw, (fan_in, fan_out), jnp.float32, -bound, bound)
    b = jax.random.uniform(kb, (1, fan_out), jnp.float32, -bound, bound)
    return w, b


def init_params(key):
    dims_p = [(3, 64), (64, 48), (48, 32), (32, 3)]
    dims_c = [(3, 64), (64, 48), (48, 32), (32, 1)]
    keys = jax.random.split(key, 8)
    param = [init_linear(keys[i], *d) for i, d in enumerate(dims_p)]
    param_c = [init_linear(keys[4 + i], *d) for i, d in enumerate(dims_c)]
    return {"param": param, "param_c": param_c}


# ------------------------------------------------------------------
# Pure-JAX reference (mirrors the PyTorch forward) for a sanity check
# ------------------------------------------------------------------
def reference_forward(c, u, s, indices, params, alpha0, gamma0, epoch):
    warm = not (epoch > 20)
    alpha0 = jnp.clip(jnp.float32(alpha0), 1.0, 10.0)
    gamma0 = jnp.clip(jnp.float32(gamma0), 0.5, 1.0)
    x = jnp.stack([c, u, s], axis=1)

    def mlp(x, layers):
        h = x
        for i, (w, b) in enumerate(layers):
            h = h @ w + b[0]
            h = jnp.maximum(h, 0.0) if i < len(layers) - 1 else jax.nn.sigmoid(h)
        return h

    p = mlp(x, params["param"])
    pc = mlp(x, params["param_c"])
    alpha = p[:, 0] * alpha0
    beta = p[:, 1]
    gamma = p[:, 2] * gamma0
    alpha_c = pc[:, 0]

    vcopen = alpha_c * (1 - c)
    vcclose = alpha_c * (-c)
    vu = alpha * c - beta * u
    vs = beta * u - gamma * s
    indices_ = indices[:, 1:].T
    cnv = c[indices_] - c
    unv = u[indices_] - u
    snv = s[indices_] - s

    if warm:
        m = u < s
        vu = jnp.where(m, jnp.minimum(vu, 0.0), jnp.maximum(vu, 0.0))
        vs = jnp.where(m, jnp.minimum(vs, 0.0), jnp.maximum(vs, 0.0))

    def cossim(a, b):
        d = jnp.sum(a * b, axis=-1)
        na = jnp.sqrt(jnp.sum(a * a, axis=-1))
        nb = jnp.sqrt(jnp.sum(b * b, axis=-1))
        return d / jnp.maximum(na * nb, EPS)

    nv2 = jnp.stack([unv, snv], axis=-1)
    v2 = jnp.stack([vu, vs], axis=-1)
    cosine = cossim(nv2, v2[None])
    idx = jnp.argmax(cosine, axis=0)
    ar = jnp.arange(c.shape[0])
    cnv_, unv_, snv_ = cnv[idx, ar], unv[idx, ar], snv[idx, ar]
    nv = jnp.stack([cnv_, unv_, snv_], axis=-1)
    vopen = jnp.stack([vcopen, vu, vs], axis=-1)
    vclose = jnp.stack([vcclose, vu, vs], axis=-1)
    cos1 = 1 - cossim(nv, vopen)
    cos2 = 1 - cossim(nv, vclose)
    vc_sel = jnp.where(cos1 <= cos2, vcopen, vcclose)
    loss = jnp.mean(cos1 + cos2) / 2 if warm else jnp.mean(jnp.minimum(cos1, cos2))
    vc = jnp.mean(vc_sel[indices_], axis=0)
    stateon = (vc >= 0).astype(jnp.float32)
    stateoff = (vc < 0).astype(jnp.float32)
    return loss, vc, vu, vs, alpha_c, alpha, beta, gamma, (stateon, stateoff)


# TODO(synk): rna_only=True branch not implemented — the original PyTorch forward
# references undefined variables (loss, vc, ...) in that branch and cannot run.

if __name__ == "__main__":
    key = jax.random.PRNGKey(0)
    K = 8
    kc, ku, ks, ki, kp = jax.random.split(key, 5)
    params = init_params(kp)
    alpha0, gamma0 = 1.0, 1.0   # direction_='complete'

    # n=256 -> exact tiling; n=300 -> padded-tail masking; epochs cover warm / not-warm.
    # max_tile kept small here only so the tiny demo still exercises a multi-tile grid;
    # production default is 1024.
    for n in (256, 300):
        c = jax.random.uniform(kc, (n,), jnp.float32, 0.0, 1.0)
        u = jax.random.uniform(ku, (n,), jnp.float32, 0.0, 2.0)
        s = jax.random.uniform(ks, (n,), jnp.float32, 0.0, 2.0)
        indices = jax.random.randint(ki, (n, K + 1), 0, n, jnp.int32)
        indices = indices.at[:, 0].set(jnp.arange(n, dtype=jnp.int32))  # col 0 = self (dropped)

        for epoch in (5, 25):
            out = dnn_layer_forward(c, u, s, indices, params, alpha0, gamma0, epoch,
                                    max_tile=256)
            out = jax.block_until_ready(out)

            ref = reference_forward(c, u, s, indices, params, alpha0, gamma0, epoch)
            loss, vc, vu, vs, alpha_c, alpha, beta, gamma, states = out
            rloss, rvc, rvu, rvs, ralpha_c, ralpha, rbeta, rgamma, rstates = ref
            checks = [(loss, rloss), (vc, rvc), (vu, rvu), (vs, rvs),
                      (alpha_c, ralpha_c), (alpha, ralpha), (beta, rbeta), (gamma, rgamma),
                      (states[0], rstates[0]), (states[1], rstates[1])]
            for a, b in checks:
                np.testing.assert_allclose(np.asarray(a), np.asarray(b), rtol=1e-4, atol=1e-4)

    print("KERNEL_OK")
</pallas_src>

<mosaic_0001>
module attributes {stable_mosaic.version = 11 : i64} {
  func.func @_fused_kernel(%arg0: i32, %arg1: memref<3x256xf32, #tpu.memory_space<vmem>>, %arg2: memref<3x8x256xf32, #tpu.memory_space<vmem>>, %arg3: memref<128x3xf32, #tpu.memory_space<vmem>>, %arg4: memref<128x1xf32, #tpu.memory_space<vmem>>, %arg5: memref<96x128xf32, #tpu.memory_space<vmem>>, %arg6: memref<96x1xf32, #tpu.memory_space<vmem>>, %arg7: memref<64x96xf32, #tpu.memory_space<vmem>>, %arg8: memref<64x1xf32, #tpu.memory_space<vmem>>, %arg9: memref<4x64xf32, #tpu.memory_space<vmem>>, %arg10: memref<4x1xf32, #tpu.memory_space<vmem>>, %arg11: memref<4x1xf32, #tpu.memory_space<vmem>>, %arg12: memref<8x256xf32, #tpu.memory_space<vmem>>) attributes {dimension_semantics = [#tpu.dimension_semantics<parallel>], iteration_bounds = array<i64: 1>, scalar_prefetch = 0 : i64, scratch_operands = 0 : i64, tpu.core_type = #tpu.core_type<tc>, window_params = [{transform_indices = @transform_0, window_bounds = array<i64: 3, 256>}, {transform_indices = @transform_1, window_bounds = array<i64: 3, 8, 256>}, {pipeline_mode = #tpu.pipeline_mode<synchronous>, transform_indices = @transform_2, window_bounds = array<i64: 128, 3>}, {pipeline_mode = #tpu.pipeline_mode<synchronous>, transform_indices = @transform_3, window_bounds = array<i64: 128, 1>}, {pipeline_mode = #tpu.pipeline_mode<synchronous>, transform_indices = @transform_4, window_bounds = array<i64: 96, 128>}, {pipeline_mode = #tpu.pipeline_mode<synchronous>, transform_indices = @transform_5, window_bounds = array<i64: 96, 1>}, {pipeline_mode = #tpu.pipeline_mode<synchronous>, transform_indices = @transform_6, window_bounds = array<i64: 64, 96>}, {pipeline_mode = #tpu.pipeline_mode<synchronous>, transform_indices = @transform_7, window_bounds = array<i64: 64, 1>}, {pipeline_mode = #tpu.pipeline_mode<synchronous>, transform_indices = @transform_8, window_bounds = array<i64: 4, 64>}, {pipeline_mode = #tpu.pipeline_mode<synchronous>, transform_indices = @transform_9, window_bounds = array<i64: 4, 1>}, {pipeline_mode = #tpu.pipeline_mode<synchronous>, transform_indices = @transform_10, window_bounds = array<i64: 4, 1>}, {transform_indices = @transform_11, window_bounds = array<i64: 8, 256>}]} {
    %c0 = arith.constant 0 : index
    %c0_0 = arith.constant 0 : index
    %0 = vector.load %arg1[%c0, %c0_0] : memref<3x256xf32, #tpu.memory_space<vmem>>, vector<3x256xf32>
    %c0_1 = arith.constant 0 : index
    %c0_2 = arith.constant 0 : index
    %1 = vector.load %arg3[%c0_1, %c0_2] : memref<128x3xf32, #tpu.memory_space<vmem>>, vector<128x3xf32>
    %cst = arith.constant dense<0.000000e+00> : vector<128x256xf32>
    %2 = tpu.matmul %1, %0, %cst {dimension_numbers = #tpu.dot_dimension_numbers<[1], [0], [0], [1], [0, 0, 1, 1], [], []>} : vector<128x3xf32>, vector<3x256xf32>, vector<128x256xf32> -> vector<128x256xf32>
    %c0_3 = arith.constant 0 : index
    %c0_4 = arith.constant 0 : index
    %3 = vector.load %arg4[%c0_3, %c0_4] : memref<128x1xf32, #tpu.memory_space<vmem>>, vector<128x1xf32>
    %4 = vector.broadcast %3 : vector<128x1xf32> to vector<128x256xf32>
    %5 = arith.addf %2, %4 : vector<128x256xf32>
    %cst_5 = arith.constant 0.000000e+00 : f32
    %6 = vector.broadcast %cst_5 : f32 to vector<128x256xf32>
    %7 = arith.maximumf %5, %6 : vector<128x256xf32>
    %c0_6 = arith.constant 0 : index
    %c0_7 = arith.constant 0 : index
    %8 = vector.load %arg5[%c0_6, %c0_7] : memref<96x128xf32, #tpu.memory_space<vmem>>, vector<96x128xf32>
    %cst_8 = arith.constant dense<0.000000e+00> : vector<96x256xf32>
    %9 = tpu.matmul %8, %7, %cst_8 {dimension_numbers = #tpu.dot_dimension_numbers<[1], [0], [0], [1], [0, 0, 1, 1], [], []>} : vector<96x128xf32>, vector<128x256xf32>, vector<96x256xf32> -> vector<96x256xf32>
    %c0_9 = arith.constant 0 : index
    %c0_10 = arith.constant 0 : index
    %10 = vector.load %arg6[%c0_9, %c0_10] : memref<96x1xf32, #tpu.memory_space<vmem>>, vector<96x1xf32>
    %11 = vector.broadcast %10 : vector<96x1xf32> to vector<96x256xf32>
    %12 = arith.addf %9, %11 : vector<96x256xf32>
    %cst_11 = arith.constant 0.000000e+00 : f32
    %13 = vector.broadcast %cst_11 : f32 to vector<96x256xf32>
    %14 = arith.maximumf %12, %13 : vector<96x256xf32>
    %c0_12 = arith.constant 0 : index
    %c0_13 = arith.constant 0 : index
    %15 = vector.load %arg7[%c0_12, %c0_13] : memref<64x96xf32, #tpu.memory_space<vmem>>, vector<64x96xf32>
    %cst_14 = arith.constant dense<0.000000e+00> : vector<64x256xf32>
    %16 = tpu.matmul %15, %14, %cst_14 {dimension_numbers = #tpu.dot_dimension_numbers<[1], [0], [0], [1], [0, 0, 1, 1], [], []>} : vector<64x96xf32>, vector<96x256xf32>, vector<64x256xf32> -> vector<64x256xf32>
    %c0_15 = arith.constant 0 : index
    %c0_16 = arith.constant 0 : index
    %17 = vector.load %arg8[%c0_15, %c0_16] : memref<64x1xf32, #tpu.memory_space<vmem>>, vector<64x1xf32>
    %18 = vector.broadcast %17 : vector<64x1xf32> to vector<64x256xf32>
    %19 = arith.addf %16, %18 : vector<64x256xf32>
    %cst_17 = arith.constant 0.000000e+00 : f32
    %20 = vector.broadcast %cst_17 : f32 to vector<64x256xf32>
    %21 = arith.maximumf %19, %20 : vector<64x256xf32>
    %c0_18 = arith.constant 0 : index
    %c0_19 = arith.constant 0 : index
    %22 = vector.load %arg9[%c0_18, %c0_19] : memref<4x64xf32, #tpu.memory_space<vmem>>, vector<4x64xf32>
    %cst_20 = arith.constant dense<0.000000e+00> : vector<4x256xf32>
    %23 = tpu.matmul %22, %21, %cst_20 {dimension_numbers = #tpu.dot_dimension_numbers<[1], [0], [0], [1], [0, 0, 1, 1], [], []>} : vector<4x64xf32>, vector<64x256xf32>, vector<4x256xf32> -> vector<4x256xf32>
    %c0_21 = arith.constant 0 : index
    %c0_22 = arith.constant 0 : index
    %24 = vector.load %arg10[%c0_21, %c0_22] : memref<4x1xf32, #tpu.memory_space<vmem>>, vector<4x1xf32>
    %25 = vector.broadcast %24 : vector<4x1xf32> to vector<4x256xf32>
    %26 = arith.addf %23, %25 : vector<4x256xf32>
    %27 = arith.negf %26 : vector<4x256xf32>
    %28 = math.exp %27 : vector<4x256xf32>
    %cst_23 = arith.constant 1.000000e+00 : f32
    %29 = vector.broadcast %cst_23 : f32 to vector<4x256xf32>
    %30 = arith.addf %29, %28 : vector<4x256xf32>
    %31 = arith.divf %29, %30 : vector<4x256xf32>
    %c0_24 = arith.constant 0 : index
    %c0_25 = arith.constant 0 : index
    %32 = vector.load %arg11[%c0_24, %c0_25] : memref<4x1xf32, #tpu.memory_space<vmem>>, vector<4x1xf32>
    %33 = vector.broadcast %32 : vector<4x1xf32> to vector<4x256xf32>
    %34 = arith.mulf %31, %33 : vector<4x256xf32>
    %35 = vector.extract_strided_slice %0 {offsets = [0, 0], sizes = [1, 256], strides = [1, 1]} : vector<3x256xf32> to vector<1x256xf32>
    %36 = vector.extract_strided_slice %0 {offsets = [1, 0], sizes = [1, 256], strides = [1, 1]} : vector<3x256xf32> to vector<1x256xf32>
    %37 = vector.extract_strided_slice %0 {offsets = [2, 0], sizes = [1, 256], strides = [1, 1]} : vector<3x256xf32> to vector<1x256xf32>
    %38 = vector.extract_strided_slice %34 {offsets = [0, 0], sizes = [1, 256], strides = [1, 1]} : vector<4x256xf32> to vector<1x256xf32>
    %39 = vector.extract_strided_slice %34 {offsets = [1, 0], sizes = [1, 256], strides = [1, 1]} : vector<4x256xf32> to vector<1x256xf32>
    %40 = vector.extract_strided_slice %34 {offsets = [2, 0], sizes = [1, 256], strides = [1, 1]} : vector<4x256xf32> to vector<1x256xf32>
    %41 = vector.extract_strided_slice %34 {offsets = [3, 0], sizes = [1, 256], strides = [1, 1]} : vector<4x256xf32> to vector<1x256xf32>
    %cst_26 = arith.constant 1.000000e+00 : f32
    %42 = vector.broadcast %cst_26 : f32 to vector<1x256xf32>
    %43 = arith.subf %42, %35 : vector<1x256xf32>
    %44 = arith.mulf %41, %43 : vector<1x256xf32>
    %cst_27 = arith.constant 0.000000e+00 : f32
    %45 = vector.broadcast %cst_27 : f32 to vector<1x256xf32>
    %46 = arith.subf %45, %35 : vector<1x256xf32>
    %47 = arith.mulf %41, %46 : vector<1x256xf32>
    %48 = arith.mulf %38, %35 : vector<1x256xf32>
    %49 = arith.mulf %39, %36 : vector<1x256xf32>
    %50 = arith.subf %48, %49 : vector<1x256xf32>
    %51 = arith.mulf %39, %36 : vector<1x256xf32>
    %52 = arith.mulf %40, %37 : vector<1x256xf32>
    %53 = arith.subf %51, %52 : vector<1x256xf32>
    %54 = arith.cmpf olt, %36, %37 : vector<1x256xf32>
    %cst_28 = arith.constant 0.000000e+00 : f32
    %55 = vector.broadcast %cst_28 : f32 to vector<1x256xf32>
    %56 = arith.minimumf %50, %55 : vector<1x256xf32>
    %cst_29 = arith.constant 0.000000e+00 : f32
    %57 = vector.broadcast %cst_29 : f32 to vector<1x256xf32>
    %58 = arith.maximumf %50, %57 : vector<1x256xf32>
    %59 = arith.select %54, %56, %58 : vector<1x256xi1>, vector<1x256xf32>
    %cst_30 = arith.constant 0.000000e+00 : f32
    %60 = vector.broadcast %cst_30 : f32 to vector<1x256xf32>
    %61 = arith.minimumf %53, %60 : vector<1x256xf32>
    %cst_31 = arith.constant 0.000000e+00 : f32
    %62 = vector.broadcast %cst_31 : f32 to vector<1x256xf32>
    %63 = arith.maximumf %53, %62 : vector<1x256xf32>
    %64 = arith.select %54, %61, %63 : vector<1x256xi1>, vector<1x256xf32>
    %c0_32 = arith.constant 0 : index
    %c0_33 = arith.constant 0 : index
    %c0_34 = arith.constant 0 : index
    %65 = vector.load %arg2[%c0_32, %c0_33, %c0_34] : memref<3x8x256xf32, #tpu.memory_space<vmem>>, vector<3x8x256xf32>
    %66 = vector.extract_strided_slice %65 {offsets = [0, 0, 0], sizes = [1, 8, 256], strides = [1, 1, 1]} : vector<3x8x256xf32> to vector<1x8x256xf32>
    %67 = vector.shape_cast %66 : vector<1x8x256xf32> to vector<8x256xf32>
    %68 = vector.broadcast %35 : vector<1x256xf32> to vector<8x256xf32>
    %69 = arith.subf %67, %68 : vector<8x256xf32>
    %70 = vector.extract_strided_slice %65 {offsets = [1, 0, 0], sizes = [1, 8, 256], strides = [1, 1, 1]} : vector<3x8x256xf32> to vector<1x8x256xf32>
    %71 = vector.shape_cast %70 : vector<1x8x256xf32> to vector<8x256xf32>
    %72 = vector.broadcast %36 : vector<1x256xf32> to vector<8x256xf32>
    %73 = arith.subf %71, %72 : vector<8x256xf32>
    %74 = vector.extract_strided_slice %65 {offsets = [2, 0, 0], sizes = [1, 8, 256], strides = [1, 1, 1]} : vector<3x8x256xf32> to vector<1x8x256xf32>
    %75 = vector.shape_cast %74 : vector<1x8x256xf32> to vector<8x256xf32>
    %76 = vector.broadcast %37 : vector<1x256xf32> to vector<8x256xf32>
    %77 = arith.subf %75, %76 : vector<8x256xf32>
    %78 = arith.mulf %59, %59 : vector<1x256xf32>
    %79 = arith.mulf %64, %64 : vector<1x256xf32>
    %80 = arith.addf %78, %79 : vector<1x256xf32>
    %81 = vector.broadcast %59 : vector<1x256xf32> to vector<8x256xf32>
    %82 = arith.mulf %73, %81 : vector<8x256xf32>
    %83 = vector.broadcast %64 : vector<1x256xf32> to vector<8x256xf32>
    %84 = arith.mulf %77, %83 : vector<8x256xf32>
    %85 = arith.addf %82, %84 : vector<8x256xf32>
    %86 = arith.mulf %73, %73 : vector<8x256xf32>
    %87 = arith.mulf %77, %77 : vector<8x256xf32>
    %88 = arith.addf %86, %87 : vector<8x256xf32>
    %89 = vector.broadcast %80 : vector<1x256xf32> to vector<8x256xf32>
    %90 = arith.mulf %88, %89 : vector<8x256xf32>
    %cst_35 = arith.constant 1.000000e-16 : f32
    %91 = vector.broadcast %cst_35 : f32 to vector<8x256xf32>
    %92 = arith.maximumf %90, %91 : vector<8x256xf32>
    %93 = math.rsqrt %92 : vector<8x256xf32>
    %94 = arith.mulf %85, %93 : vector<8x256xf32>
    %95 = tpu.iota {dimensions = array<i32: 0>} : vector<8x256xi32>
    %cst_36 = arith.constant dense<0xFF800000> : vector<256xf32>
    %96 = vector.multi_reduction <maximumf>, %94, %cst_36 [0] : vector<8x256xf32> to vector<256xf32>
    %97 = vector.shape_cast %96 : vector<256xf32> to vector<1x256xf32>
    %98 = vector.broadcast %97 : vector<1x256xf32> to vector<8x256xf32>
    %99 = arith.cmpf oge, %94, %98 : vector<8x256xf32>
    %c8_i32 = arith.constant 8 : i32
    %100 = vector.broadcast %c8_i32 : i32 to vector<8x256xi32>
    %101 = arith.select %99, %95, %100 : vector<8x256xi1>, vector<8x256xi32>
    %cst_37 = arith.constant dense<2147483647> : vector<256xi32>
    %102 = vector.multi_reduction <minsi>, %101, %cst_37 [0] : vector<8x256xi32> to vector<256xi32>
    %103 = vector.shape_cast %102 : vector<256xi32> to vector<1x256xi32>
    %104 = vector.broadcast %103 : vector<1x256xi32> to vector<8x256xi32>
    %105 = arith.cmpi eq, %95, %104 : vector<8x256xi32>
    %106 = arith.extui %105 : vector<8x256xi1> to vector<8x256xi32>
    %107 = arith.sitofp %106 : vector<8x256xi32> to vector<8x256xf32>
    %108 = arith.mulf %107, %69 : vector<8x256xf32>
    %cst_38 = arith.constant dense<0.000000e+00> : vector<256xf32>
    %109 = vector.multi_reduction <add>, %108, %cst_38 [0] : vector<8x256xf32> to vector<256xf32>
    %110 = vector.shape_cast %109 : vector<256xf32> to vector<1x256xf32>
    %111 = arith.mulf %107, %73 : vector<8x256xf32>
    %cst_39 = arith.constant dense<0.000000e+00> : vector<256xf32>
    %112 = vector.multi_reduction <add>, %111, %cst_39 [0] : vector<8x256xf32> to vector<256xf32>
    %113 = vector.shape_cast %112 : vector<256xf32> to vector<1x256xf32>
    %114 = arith.mulf %107, %77 : vector<8x256xf32>
    %cst_40 = arith.constant dense<0.000000e+00> : vector<256xf32>
    %115 = vector.multi_reduction <add>, %114, %cst_40 [0] : vector<8x256xf32> to vector<256xf32>
    %116 = vector.shape_cast %115 : vector<256xf32> to vector<1x256xf32>
    %117 = arith.mulf %110, %110 : vector<1x256xf32>
    %118 = arith.mulf %113, %113 : vector<1x256xf32>
    %119 = arith.addf %117, %118 : vector<1x256xf32>
    %120 = arith.mulf %116, %116 : vector<1x256xf32>
    %121 = arith.addf %119, %120 : vector<1x256xf32>
    %122 = arith.mulf %113, %59 : vector<1x256xf32>
    %123 = arith.mulf %116, %64 : vector<1x256xf32>
    %124 = arith.addf %122, %123 : vector<1x256xf32>
    %125 = arith.mulf %110, %44 : vector<1x256xf32>
    %126 = arith.addf %125, %124 : vector<1x256xf32>
    %127 = arith.mulf %44, %44 : vector<1x256xf32>
    %128 = arith.addf %127, %80 : vector<1x256xf32>
    %129 = arith.mulf %121, %128 : vector<1x256xf32>
    %cst_41 = arith.constant 1.000000e-16 : f32
    %130 = vector.broadcast %cst_41 : f32 to vector<1x256xf32>
    %131 = arith.maximumf %129, %130 : vector<1x256xf32>
    %132 = math.rsqrt %131 : vector<1x256xf32>
    %133 = arith.mulf %126, %132 : vector<1x256xf32>
    %cst_42 = arith.constant 1.000000e+00 : f32
    %134 = vector.broadcast %cst_42 : f32 to vector<1x256xf32>
    %135 = arith.subf %134, %133 : vector<1x256xf32>
    %136 = arith.mulf %110, %47 : vector<1x256xf32>
    %137 = arith.addf %136, %124 : vector<1x256xf32>
    %138 = arith.mulf %47, %47 : vector<1x256xf32>
    %139 = arith.addf %138, %80 : vector<1x256xf32>
    %140 = arith.mulf %121, %139 : vector<1x256xf32>
    %cst_43 = arith.constant 1.000000e-16 : f32
    %141 = vector.broadcast %cst_43 : f32 to vector<1x256xf32>
    %142 = arith.maximumf %140, %141 : vector<1x256xf32>
    %143 = math.rsqrt %142 : vector<1x256xf32>
    %144 = arith.mulf %137, %143 : vector<1x256xf32>
    %cst_44 = arith.constant 1.000000e+00 : f32
    %145 = vector.broadcast %cst_44 : f32 to vector<1x256xf32>
    %146 = arith.subf %145, %144 : vector<1x256xf32>
    %147 = arith.cmpf ole, %135, %146 : vector<1x256xf32>
    %148 = arith.select %147, %44, %47 : vector<1x256xi1>, vector<1x256xf32>
    %149 = arith.addf %135, %146 : vector<1x256xf32>
    %cst_45 = arith.constant 5.000000e-01 : f32
    %150 = vector.broadcast %cst_45 : f32 to vector<1x256xf32>
    %151 = arith.mulf %149, %150 : vector<1x256xf32>
    %152 = tpu.iota {dimensions = array<i32: 1>} : vector<1x256xi32>
    %c256_i32 = arith.constant 256 : i32
    %153 = arith.muli %arg0, %c256_i32 : i32
    %154 = vector.broadcast %153 : i32 to vector<1x256xi32>
    %155 = arith.addi %154, %152 : vector<1x256xi32>
    %c256_i32_46 = arith.constant 256 : i32
    %156 = vector.broadcast %c256_i32_46 : i32 to vector<1x256xi32>
    %157 = arith.cmpi slt, %155, %156 : vector<1x256xi32>
    %158 = arith.extui %157 : vector<1x256xi1> to vector<1x256xi32>
    %159 = arith.sitofp %158 : vector<1x256xi32> to vector<1x256xf32>
    %160 = arith.mulf %151, %159 : vector<1x256xf32>
    %161 = tpu.concatenate %59, %64, %148, %34, %160 in 0 : vector<1x256xf32>, vector<1x256xf32>, vector<1x256xf32>, vector<4x256xf32>, vector<1x256xf32> -> vector<8x256xf32>
    %c0_47 = arith.constant 0 : index
    %c0_48 = arith.constant 0 : index
    %162 = vector.load %arg12[%c0_47, %c0_48] : memref<8x256xf32, #tpu.memory_space<vmem>>, vector<8x256xf32>
    tpu.vector_store %arg12[%c0_47, %c0_48], %161 {strides = array<i32>} : memref<8x256xf32, #tpu.memory_space<vmem>>, vector<8x256xf32>,
    return
  }
  func.func @transform_0(%arg0: i32) -> (i32, i32) {
    %c0_i32 = arith.constant 0 : i32
    %c0_i32_0 = arith.constant 0 : i32
    return %c0_i32, %arg0 : i32, i32
  }
  func.func @transform_1(%arg0: i32) -> (i32, i32, i32) {
    %c0_i32 = arith.constant 0 : i32
    %c0_i32_0 = arith.constant 0 : i32
    %c0_i32_1 = arith.constant 0 : i32
    return %c0_i32, %c0_i32_0, %arg0 : i32, i32, i32
  }
  func.func @transform_2(%arg0: i32) -> (i32, i32) {
    %c0_i32 = arith.constant 0 : i32
    %c0_i32_0 = arith.constant 0 : i32
    %c0_i32_1 = arith.constant 0 : i32
    return %c0_i32, %c0_i32_0 : i32, i32
  }
  func.func @transform_3(%arg0: i32) -> (i32, i32) {
    %c0_i32 = arith.constant 0 : i32
    %c0_i32_0 = arith.constant 0 : i32
    %c0_i32_1 = arith.constant 0 : i32
    return %c0_i32, %c0_i32_0 : i32, i32
  }
  func.func @transform_4(%arg0: i32) -> (i32, i32) {
    %c0_i32 = arith.constant 0 : i32
    %c0_i32_0 = arith.constant 0 : i32
    %c0_i32_1 = arith.constant 0 : i32
    return %c0_i32, %c0_i32_0 : i32, i32
  }
  func.func @transform_5(%arg0: i32) -> (i32, i32) {
    %c0_i32 = arith.constant 0 : i32
    %c0_i32_0 = arith.constant 0 : i32
    %c0_i32_1 = arith.constant 0 : i32
    return %c0_i32, %c0_i32_0 : i32, i32
  }
  func.func @transform_6(%arg0: i32) -> (i32, i32) {
    %c0_i32 = arith.constant 0 : i32
    %c0_i32_0 = arith.constant 0 : i32
    %c0_i32_1 = arith.constant 0 : i32
    return %c0_i32, %c0_i32_0 : i32, i32
  }
  func.func @transform_7(%arg0: i32) -> (i32, i32) {
    %c0_i32 = arith.constant 0 : i32
    %c0_i32_0 = arith.constant 0 : i32
    %c0_i32_1 = arith.constant 0 : i32
    return %c0_i32, %c0_i32_0 : i32, i32
  }
  func.func @transform_8(%arg0: i32) -> (i32, i32) {
    %c0_i32 = arith.constant 0 : i32
    %c0_i32_0 = arith.constant 0 : i32
    %c0_i32_1 = arith.constant 0 : i32
    return %c0_i32, %c0_i32_0 : i32, i32
  }
  func.func @transform_9(%arg0: i32) -> (i32, i32) {
    %c0_i32 = arith.constant 0 : i32
    %c0_i32_0 = arith.constant 0 : i32
    %c0_i32_1 = arith.constant 0 : i32
    return %c0_i32, %c0_i32_0 : i32, i32
  }
  func.func @transform_10(%arg0: i32) -> (i32, i32) {
    %c0_i32 = arith.constant 0 : i32
    %c0_i32_0 = arith.constant 0 : i32
    %c0_i32_1 = arith.constant 0 : i32
    return %c0_i32, %c0_i32_0 : i32, i32
  }
  func.func @transform_11(%arg0: i32) -> (i32, i32) {
    %c0_i32 = arith.constant 0 : i32
    %c0_i32_0 = arith.constant 0 : i32
    return %c0_i32, %arg0 : i32, i32
  }
}

</mosaic_0001>

<bundles_post_ra>
// kernel: tpu_custom_call.1
= control target key start
LH: loop header
LB: loop body
LE: loop exit
PB: predicated region body
PF: predicated region fallthrough
CT: control target
= control target key end

     0   :  { %v1418_v3 = vmov 0   ;;  %vm205_vm0 = vcmask 1042432   ;;  %s1987_s0 = inlined_call_operand.vmem [shape: f32[3,256], index: 0, kind: input, shape index: {}]   ;;  %s1988_s1 = inlined_call_operand.vmem [shape: f32[3,8,256], index: 1, kind: input, shape index: {}]   ;;  %s1989_s2 = inlined_call_operand.vmem [shape: f32[128,3], index: 2, kind: input, shape index: {}]   ;;  %s1990_s3 = inlined_call_operand.vmem [shape: f32[128,1], index: 3, kind: input, shape index: {}]   ;;  %s1991_s4 = inlined_call_operand.vmem [shape: f32[96,128], index: 4, kind: input, shape index: {}]   ;;  %s1992_s5 = inlined_call_operand.vmem [shape: f32[96,1], index: 5, kind: input, shape index: {}]   ;;  %s1993_s6 = inlined_call_operand.vmem [shape: f32[64,96], index: 6, kind: input, shape index: {}]   ;;  %s1994_s7 = inlined_call_operand.vmem [shape: f32[64,1], index: 7, kind: input, shape index: {}]   ;;  %s1995_s8 = inlined_call_operand.vmem [shape: f32[4,64], index: 8, kind: input, shape index: {}]   ;;  %s1996_s9 = inlined_call_operand.vmem [shape: f32[4,1], index: 9, kind: input, shape index: {}]   ;;  %s1997_s10 = inlined_call_operand.vmem [shape: f32[4,1], index: 10, kind: input, shape index: {}]   ;;  %s1998_s11 = inlined_call_operand.hbm [shape: f32[8,256], index: 11, kind: output, shape index: {}]  }
   0x1   :  { %v71_v0 = vld [vmem:[%s1990_s3 + $0x78] sm:$0xff]  ;;  %v69_v1 = vld [vmem:[%s1990_s3 + $0x68] sm:$0xff]  ;;  %v1490_v2 = vld [vmem:[%s1987_s0] sm:$0x77]  ;;  %1369 = vset.pattern.permute.xlu0 %v1418_v3  ;;  %1370 = vset.pattern.permute.xlu1 %v1418_v3 }
   0x2   :  { %153 = vst [vmem:[#allocation1] ss:$2 sm:$0xff] %v1490_v2  ;;  %149 = vperm.xlu0 %1369, %v71_v0   ;;  %139 = vperm.xlu1 %1370, %v69_v1   ;;  %v67_v4 = vld [vmem:[%s1990_s3 + $0x58] sm:$0xff] }
   0x3   :  { %1371 = vset.pattern.permute.xlu2 %v1418_v3 }
   0x4   :  { %129 = vperm.xlu2 %1371, %v67_v4  }
   0x5   :  { %16 = vsyncpa [#allocation3], 0  ;;  %v70_v5 = vld [vmem:[%s1990_s3 + $0x70] sm:$0xff]  ;;  %v40_v6 = vld [vmem:[%s1989_s2] sm:$0xff]  ;;  %vm156_vm1 = vcmask 23552   ;;  %vm642_vm2 = vcmask 785408  }
   0x6   :  { %v68_v7 = vld [vmem:[%s1990_s3 + $0x60] sm:$0xff]  ;;  %v66_v10 = vld [vmem:[%s1990_s3 + $0x50] sm:$0xff]  ;;  %v65_v11 = vld [vmem:[%s1990_s3 + $0x48] sm:$0xff]  ;;  %vm772_vm3 = vcmask 523264   ;;  %vm923_vm13 = vcmask 1043456  }
   0x7   :  { %v41_v12 = vld [vmem:[%s1989_s2 + $0x8] sm:$0xff]  ;;  %v64_v13 = vld [vmem:[%s1990_s3 + $0x40] sm:$0xff]  ;;  %v63_v14 = vld [vmem:[%s1990_s3 + $0x38] sm:$0xff] }
   0x8   :  { %v62_v15 = vld [vmem:[%s1990_s3 + $0x30] sm:$0xff]  ;;  %v61_v17 = vld [vmem:[%s1990_s3 + $0x28] sm:$0xff]  ;;  %v60_v18 = vld [vmem:[%s1990_s3 + $0x20] sm:$0xff] }
   0x9   :  { %v154_v8 = vld.sshfl [vmem:[#allocation1] sm:$0xff pattern:$0x75316420]  ;;  %v155_v9 = vld.sshfl [vmem:[#allocation1 + $0x8] sm:$0xff pattern:$0x75316420] }
   0xa   :  { %1277 = vmatpush.msk.msra.mxu0 %vm205_vm0, %v154_v8  ;;  %1294 = vmatpush.msk.msra.mxu1 %vm205_vm0, %v155_v9  ;;  %v42_v16 = vld [vmem:[%s1989_s2 + $0x10] sm:$0xff]  ;;  %v59_v19 = vld [vmem:[%s1990_s3 + $0x18] sm:$0xff]  ;;  %v57_v22 = vld [vmem:[%s1990_s3 + $0x8] sm:$0xff] }
   0xb   :  { %144 = vperm.xlu0 %1369, %v70_v5   ;;  %1278 = vmatmul.msk.f32.vlgmr.msra.gmra.mxu0 %vm156_vm1, %v40_v6  ;;  %v43_v20 = vld [vmem:[%s1989_s2 + $0x18] sm:$0xff]  ;;  %v58_v21 = vld [vmem:[%s1990_s3 + $0x10] sm:$0xff]  ;;  %v56_v23 = vld [vmem:[%s1990_s3] sm:$0xff] }
   0xc   :  { %1295 = vmatmul.msk.f32.vlgmr.msra.gmra.mxu1 %vm156_vm1, %v40_v6  ;;  %134 = vperm.xlu1 %1370, %v68_v7   ;;  %v44_v24 = vld [vmem:[%s1989_s2 + $0x20] sm:$0xff]  ;;  %v395_v25 = vld [vmem:[%s1992_s5 + $0x58] sm:$0xff]  ;;  %v45_v26 = vld [vmem:[%s1989_s2 + $0x28] sm:$0xff] }
   0xd   :  { %124 = vperm.xlu2 %1371, %v66_v10   ;;  %v393_v27 = vld [vmem:[%s1992_s5 + $0x48] sm:$0xff]  ;;  %v392_v28 = vld [vmem:[%s1992_s5 + $0x40] sm:$0xff]  ;;  %v46_v29 = vld [vmem:[%s1989_s2 + $0x30] sm:$0xff] }
   0xe   :  { %v390_v30 = vld [vmem:[%s1992_s5 + $0x30] sm:$0xff]  ;;  %v389_v31 = vld [vmem:[%s1992_s5 + $0x28] sm:$0xff]  ;;  %v47_v32 = vld [vmem:[%s1989_s2 + $0x38] sm:$0xff] }
   0xf   :  { %v387_v33 = vld [vmem:[%s1992_s5 + $0x18] sm:$0xff]  ;;  %v386_v34 = vld [vmem:[%s1992_s5 + $0x10] sm:$0xff]  ;;  %v48_v35 = vld [vmem:[%s1989_s2 + $0x40] sm:$0xff] }
  0x10   :  { %v384_v36 = vld [vmem:[%s1992_s5] sm:$0xff]  ;;  %v601_v37 = vld [vmem:[%s1994_s7 + $0x38] sm:$0xff]  ;;  %v394_v38 = vld [vmem:[%s1992_s5 + $0x50] sm:$0xff] }
  0x11   :  { %v49_v39 = vld [vmem:[%s1989_s2 + $0x48] sm:$0xff]  ;;  %v598_v41 = vld [vmem:[%s1994_s7 + $0x20] sm:$0xff]  ;;  %v391_v42 = vld [vmem:[%s1992_s5 + $0x38] sm:$0xff] }
  0x12   :  { %v599_v40 = vld [vmem:[%s1994_s7 + $0x28] sm:$0xff]  ;;  %v50_v43 = vld [vmem:[%s1989_s2 + $0x50] sm:$0xff]  ;;  %v388_v46 = vld [vmem:[%s1992_s5 + $0x20] sm:$0xff] }
  0x13   :  { %119 = vperm.xlu0 %1369, %v65_v11   ;;  %1279 = vmatmul.msk.f32.gmra.mxu0 %vm156_vm1, %v41_v12  ;;  %v596_v44 = vld [vmem:[%s1994_s7 + $0x10] sm:$0xff]  ;;  %v595_v45 = vld [vmem:[%s1994_s7 + $0x8] sm:$0xff]  ;;  %v51_v47 = vld [vmem:[%s1989_s2 + $0x58] sm:$0xff] }
  0x14   :  { %1296 = vmatmul.msk.f32.gmra.mxu1 %vm156_vm1, %v41_v12  ;;  %114 = vperm.xlu1 %1370, %v64_v13   ;;  %v766_v48 = vld [vmem:[%s1996_s9] sm:$0xf]  ;;  %v385_v51 = vld [vmem:[%s1992_s5 + $0x8] sm:$0xff]  ;;  %v600_v53 = vld [vmem:[%s1994_s7 + $0x30] sm:$0xff] }
  0x15   :  { %109 = vperm.xlu2 %1371, %v63_v14   ;;  %v854_v49 = vld [vmem:[%s1997_s10] sm:$0xf]  ;;  %v53_v52 = vld [vmem:[%s1989_s2 + $0x68] sm:$0xff]  ;;  %v54_v54 = vld [vmem:[%s1989_s2 + $0x70] sm:$0xff] }
  0x16   :  { %v52_v50 = vld [vmem:[%s1989_s2 + $0x60] sm:$0xff]  ;;  %v597_v55 = vld [vmem:[%s1994_s7 + $0x18] sm:$0xff] }
  0x17   :  { %v55_v56 = vld [vmem:[%s1989_s2 + $0x78] sm:$0xff]  ;;  %v594_v57 = vld [vmem:[%s1994_s7] sm:$0xff]  ;;  %s1268_s7 = sshll.u32 %s1998_s11, 4  ;;  %s1269_s7 = int_to_ptr.hbm [resolvable:$true] %s1268_s7 }
  0x1b   :  { %104 = vperm.xlu0 %1369, %v62_v15   ;;  %1280 = vmatmul.msk.f32.gmra.mxu0 %vm156_vm1, %v42_v16 }
  0x1c   :  { %1297 = vmatmul.msk.f32.gmra.mxu1 %vm156_vm1, %v42_v16  ;;  %99 = vperm.xlu1 %1370, %v61_v17  }
  0x1d   :  { %94 = vperm.xlu2 %1371, %v60_v18  }
  0x23   :  { %89 = vperm.xlu0 %1369, %v59_v19   ;;  %1281 = vmatmul.msk.f32.gmra.mxu0 %vm156_vm1, %v43_v20 }
  0x24   :  { %1298 = vmatmul.msk.f32.gmra.mxu1 %vm156_vm1, %v43_v20  ;;  %84 = vperm.xlu1 %1370, %v58_v21  }
  0x25   :  { %79 = vperm.xlu2 %1371, %v57_v22  }
  0x2b   :  { %74 = vperm.xlu0 %1369, %v56_v23   ;;  %1282 = vmatmul.msk.f32.gmra.mxu0 %vm156_vm1, %v44_v24 }
  0x2c   :  { %1299 = vmatmul.msk.f32.gmra.mxu1 %vm156_vm1, %v44_v24  ;;  %453 = vperm.xlu1 %1370, %v395_v25  }
  0x2d   :  { %448 = vperm.xlu2 %1371, %v394_v38  }
  0x33   :  { %1283 = vmatmul.msk.f32.gmra.mxu0 %vm156_vm1, %v45_v26  ;;  %443 = vperm.xlu0 %1369, %v393_v27  }
  0x34   :  { %1300 = vmatmul.msk.f32.gmra.mxu1 %vm156_vm1, %v45_v26  ;;  %438 = vperm.xlu1 %1370, %v392_v28  }
  0x35   :  { %433 = vperm.xlu2 %1371, %v391_v42  }
  0x3b   :  { %1284 = vmatmul.msk.f32.gmra.mxu0 %vm156_vm1, %v46_v29  ;;  %428 = vperm.xlu0 %1369, %v390_v30  }
  0x3c   :  { %1301 = vmatmul.msk.f32.gmra.mxu1 %vm156_vm1, %v46_v29  ;;  %423 = vperm.xlu1 %1370, %v389_v31  }
  0x3d   :  { %418 = vperm.xlu2 %1371, %v388_v46  }
  0x43   :  { %1285 = vmatmul.msk.f32.gmra.mxu0 %vm156_vm1, %v47_v32  ;;  %413 = vperm.xlu0 %1369, %v387_v33  }
  0x44   :  { %1302 = vmatmul.msk.f32.gmra.mxu1 %vm156_vm1, %v47_v32  ;;  %408 = vperm.xlu1 %1370, %v386_v34  }
  0x45   :  { %403 = vperm.xlu2 %1371, %v385_v51  }
  0x4b   :  { %1286 = vmatmul.msk.f32.gmra.mxu0 %vm156_vm1, %v48_v35  ;;  %398 = vperm.xlu0 %1369, %v384_v36  }
  0x4c   :  { %1303 = vmatmul.msk.f32.gmra.mxu1 %vm156_vm1, %v48_v35  ;;  %639 = vperm.xlu1 %1370, %v601_v37  }
  0x4d   :  { %634 = vperm.xlu2 %1371, %v600_v53  }
  0x53   :  { %1287 = vmatmul.msk.f32.gmra.mxu0 %vm156_vm1, %v49_v39  ;;  %629 = vperm.xlu0 %1369, %v599_v40  }
  0x54   :  { %1304 = vmatmul.msk.f32.gmra.mxu1 %vm156_vm1, %v49_v39  ;;  %624 = vperm.xlu1 %1370, %v598_v41  }
  0x55   :  { %619 = vperm.xlu2 %1371, %v597_v55  }
  0x5b   :  { %1288 = vmatmul.msk.f32.gmra.mxu0 %vm156_vm1, %v50_v43  ;;  %614 = vperm.xlu0 %1369, %v596_v44  }
  0x5c   :  { %1305 = vmatmul.msk.f32.gmra.mxu1 %vm156_vm1, %v50_v43  ;;  %609 = vperm.xlu1 %1370, %v595_v45  }
  0x5d   :  { %604 = vperm.xlu2 %1371, %v594_v57  }
  0x5e   :  { %v130_v24 = vpop.permute.xlu2 %129 }
  0x63   :  { %1289 = vmatmul.msk.f32.gmra.mxu0 %vm156_vm1, %v51_v47  ;;  %769 = vperm.xlu0 %1369, %v766_v48  }
  0x64   :  { %1306 = vmatmul.msk.f32.gmra.mxu1 %vm156_vm1, %v51_v47  ;;  %857 = vperm.xlu1 %1370, %v854_v49  }
  0x67   :  { %v125_v30 = vpop.permute.xlu2 %124 }
  0x6b   :  { %1290 = vmatmul.msk.f32.gmra.mxu0 %vm156_vm1, %v52_v50 }
  0x6c   :  { %1307 = vmatmul.msk.f32.gmra.mxu1 %vm156_vm1, %v52_v50 }
  0x6f   :  { %v110_v43 = vpop.permute.xlu2 %109 }
  0x73   :  { %1291 = vmatmul.msk.f32.gmra.mxu0 %vm156_vm1, %v53_v52 }
  0x74   :  { %1308 = vmatmul.msk.f32.gmra.mxu1 %vm156_vm1, %v53_v52  ;;  %v150_v19 = vpop.permute.xlu0 %149  ;;  %v140_v22 = vpop.permute.xlu1 %139 }
  0x7b   :  { %1292 = vmatmul.msk.f32.gmra.mxu0 %vm156_vm1, %v54_v54 }
  0x7c   :  { %1309 = vmatmul.msk.f32.gmra.mxu1 %vm156_vm1, %v54_v54 }
  0x7d   :  { %v145_v26 = vpop.permute.xlu0 %144 }
  0x7e   :  { %v135_v28 = vpop.permute.xlu1 %134 }
  0x83   :  { %1293 = vmatmul.msk.f32.gmra.mxu0 %vm156_vm1, %v55_v56 }
  0x84   :  { %1310 = vmatmul.msk.f32.gmra.mxu1 %vm156_vm1, %v55_v56 }
  0x85   :  { %v120_v31 = vpop.permute.xlu0 %119 }
  0x86   :  { %v115_v38 = vpop.permute.xlu1 %114 }
  0x88   :  { %v1683_v58 = vpop.f32.mrf.mxu0 }
  0x89   :  { %v1685_v59 = vpop.f32.mrf.mxu1 }
  0x8d   :  { %v105_v46 = vpop.permute.xlu0 %104 }
  0x90   :  { %v1687_v60 = vpop.f32.mrf.mxu0 }
  0x91   :  { %v1689_v61 = vpop.f32.mrf.mxu1 }
  0x98   :  { %v1691_v62 = vpop.f32.mrf.mxu0 }
  0x99   :  { %v1693_v63 = vpop.f32.mrf.mxu1 }
  0xa0   :  { %v1695_v0 = vpop.f32.mrf.mxu0 }
  0xa1   :  { %v1697_v1 = vpop.f32.mrf.mxu1 }
  0xa8   :  { %v1699_v3 = vpop.f32.mrf.mxu0 }
  0xa9   :  { %v1701_v4 = vpop.f32.mrf.mxu1 }
  0xb0   :  { %v1703_v5 = vpop.f32.mrf.mxu0 }
  0xb1   :  { %v1705_v6 = vpop.f32.mrf.mxu1 }
  0xb8   :  { %v1707_v7 = vpop.f32.mrf.mxu0 }
  0xb9   :  { %v1709_v8 = vpop.f32.mrf.mxu1 }
  0xc0   :  { %v1711_v9 = vpop.f32.mrf.mxu0 }
  0xc1   :  { %v1713_v10 = vpop.f32.mrf.mxu1 }
  0xc8   :  { %v1715_v11 = vpop.f32.mrf.mxu0 }
  0xc9   :  { %v1717_v12 = vpop.f32.mrf.mxu1 }
  0xd0   :  { %v254_v13 = vpop.f32.mrf.mxu0 }
  0xd1   :  { %v319_v14 = vpop.f32.mrf.mxu1  ;;  %v255_v57 = vadd.f32 %v254_v13, %v120_v31  ;;  %v249_v13 = vadd.f32 %v1711_v9, %v110_v43 }
  0xd8   :  { %v257_v15 = vpop.f32.mrf.mxu0 }
  0xd9   :  { %v322_v16 = vpop.f32.mrf.mxu1  ;;  %v258_v53 = vadd.f32 %v257_v15, %v125_v30  ;;  %v317_v15 = vadd.f32 %v1717_v12, %v115_v38  ;;  %v311_v12 = vadd.f32 %v1709_v8, %v105_v46 }
  0xda   :  { %v323_v55 = vadd.f32 %v322_v16, %v125_v30 }
  0xdc   :  { %v361_v16 = vmax.f32 %v323_v55, 0.0  ;;  %v383_v55 = vld [vmem:[%s1991_s4 + $0x58] sm:$0xff] }
  0xe0   :  { %v260_v17 = vpop.f32.mrf.mxu0 }
  0xe1   :  { %v325_v18 = vpop.f32.mrf.mxu1  ;;  %v261_v49 = vadd.f32 %v260_v17, %v130_v24  ;;  %v320_v17 = vadd.f32 %v319_v14, %v120_v31  ;;  %v90_v14 = vpop.permute.xlu0 %89 }
  0xe2   :  { %v326_v51 = vadd.f32 %v325_v18, %v130_v24  ;;  %v100_v18 = vpop.permute.xlu1 %99  ;;  %v358_v24 = vmax.f32 %v255_v57, 0.0 }
  0xe3   :  { %v243_v9 = vadd.f32 %v1703_v5, %v100_v18  ;;  %v237_v5 = vadd.f32 %v1695_v0, %v90_v14 }
  0xe8   :  { %v263_v20 = vpop.f32.mrf.mxu0 }
  0xe9   :  { %v328_v21 = vpop.f32.mrf.mxu1  ;;  %v264_v44 = vadd.f32 %v263_v20, %v135_v28  ;;  %v363_v20 = vmax.f32 %v326_v51, 0.0  ;;  %v379_v51 = vld [vmem:[%s1991_s4 + $0x38] sm:$0xff] }
  0xea   :  { %v329_v47 = vadd.f32 %v328_v21, %v135_v28  ;;  %v252_v21 = vadd.f32 %v1715_v11, %v115_v38  ;;  %v246_v11 = vadd.f32 %v1707_v7, %v105_v46  ;;  %v357_v28 = vmax.f32 %v317_v15, 0.0  ;;  %v75_v38 = vpop.permute.xlu0 %74  ;;  %v373_v46 = vld [vmem:[%s1991_s4 + $0x8] sm:$0xff] }
  0xeb   :  { %v364_v54 = vmax.f32 %v264_v44, 0.0 }
  0xec   :  { %v365_v56 = vmax.f32 %v329_v47, 0.0  ;;  %v352_v31 = vmax.f32 %v246_v11, 0.0  ;;  %v376_v47 = vld [vmem:[%s1991_s4 + $0x20] sm:$0xff] }
  0xf0   :  { %v266_v23 = vpop.f32.mrf.mxu0 }
  0xf1   :  { %v331_v25 = vpop.f32.mrf.mxu1  ;;  %v267_v39 = vadd.f32 %v266_v23, %v140_v22  ;;  %v95_v23 = vpop.permute.xlu2 %94 }
  0xf2   :  { %v332_v41 = vadd.f32 %v331_v25, %v140_v22  ;;  %v360_v22 = vmax.f32 %v258_v53, 0.0  ;;  %v314_v25 = vadd.f32 %v1713_v10, %v110_v43  ;;  %v308_v10 = vadd.f32 %v1705_v6, %v100_v18  ;;  %v381_v53 = vld [vmem:[%s1991_s4 + $0x48] sm:$0xff]  ;;  %v444_v11 = vpop.permute.xlu0 %443 }
  0xf3   :  { %v366_v50 = vmax.f32 %v267_v39, 0.0  ;;  %v240_v7 = vadd.f32 %v1699_v3, %v95_v23  ;;  %v305_v8 = vadd.f32 %v1701_v4, %v95_v23  ;;  %v302_v6 = vadd.f32 %v1697_v1, %v90_v14 }
  0xf4   :  { %v367_v52 = vmax.f32 %v332_v41, 0.0  ;;  %v355_v30 = vmax.f32 %v314_v25, 0.0  ;;  %v293_v43 = vadd.f32 %v1685_v59, %v75_v38  ;;  %v375_v59 = vld [vmem:[%s1991_s4 + $0x18] sm:$0xff] }
  0xf5   :  { %v349_v39 = vmax.f32 %v305_v8, 0.0  ;;  %v347_v41 = vmax.f32 %v302_v6, 0.0 }
  0xf8   :  { %v269_v27 = vpop.f32.mrf.mxu0 }
  0xf9   :  { %v334_v29 = vpop.f32.mrf.mxu1  ;;  %v270_v33 = vadd.f32 %v269_v27, %v145_v26  ;;  %v356_v27 = vmax.f32 %v252_v21, 0.0  ;;  %v80_v3 = vpop.permute.xlu2 %79 }
  0xfa   :  { %v335_v36 = vadd.f32 %v334_v29, %v145_v26  ;;  %v359_v26 = vmax.f32 %v320_v17, 0.0  ;;  %v354_v29 = vmax.f32 %v249_v13, 0.0  ;;  %v231_v0 = vadd.f32 %v1687_v60, %v80_v3 }
  0xfb   :  { %v368_v45 = vmax.f32 %v270_v33, 0.0  ;;  %v85_v33 = vpop.permute.xlu1 %84  ;;  %v296_v1 = vadd.f32 %v1689_v61, %v80_v3 }
  0xfc   :  { %v369_v48 = vmax.f32 %v335_v36, 0.0  ;;  %v234_v36 = vadd.f32 %v1691_v62, %v85_v33  ;;  %v299_v4 = vadd.f32 %v1693_v63, %v85_v33  ;;  %v342_v44 = vmax.f32 %v231_v0, 0.0 }
  0xfd   :  { %v343_v60 = vmax.f32 %v296_v1, 0.0 }
  0xfe   :  { %v344_v62 = vmax.f32 %v234_v36, 0.0  ;;  %v345_v63 = vmax.f32 %v299_v4, 0.0 }
 0x100   :  { %v272_v32 = vpop.f32.mrf.mxu0 }
 0x101   :  { %v273_v34 = vadd.f32 %v272_v32, %v150_v19  ;;  %v337_v35 = vpop.f32.mrf.mxu1  ;;  %v353_v32 = vmax.f32 %v311_v12, 0.0 }
 0x102   :  { %v338_v37 = vadd.f32 %v337_v35, %v150_v19  ;;  %v362_v19 = vmax.f32 %v261_v49, 0.0  ;;  %v351_v35 = vmax.f32 %v308_v10, 0.0  ;;  %v377_v49 = vld [vmem:[%s1991_s4 + $0x28] sm:$0xff] }
 0x103   :  { %v370_v40 = vmax.f32 %v273_v34, 0.0  ;;  %v350_v34 = vmax.f32 %v243_v9, 0.0  ;;  %v454_v25 = vpop.permute.xlu1 %453 }
 0x104   :  { %v371_v42 = vmax.f32 %v338_v37, 0.0  ;;  %v348_v37 = vmax.f32 %v240_v7, 0.0 }
 0x105   :  { %456 = vmatpush.msrb.mxu0 %v370_v40  ;;  %1334 = vmatpush.msra.mxu2 %v370_v40  ;;  %v346_v40 = vmax.f32 %v237_v5, 0.0 }
 0x106   :  { %509 = vmatpush.msrb.mxu1 %v371_v42  ;;  %1350 = vmatpush.msra.mxu3 %v371_v42  ;;  %v228_v42 = vadd.f32 %v1683_v58, %v75_v38  ;;  %v372_v58 = vld [vmem:[%s1991_s4] sm:$0xff] }
 0x107   :  { %457 = vmatpush.msrb.mxu0 %v368_v45  ;;  %1335 = vmatpush.msra.mxu2 %v368_v45  ;;  %v341_v45 = vmax.f32 %v293_v43, 0.0 }
 0x108   :  { %510 = vmatpush.msrb.mxu1 %v369_v48  ;;  %1351 = vmatpush.msra.mxu3 %v369_v48  ;;  %v340_v61 = vmax.f32 %v228_v42, 0.0  ;;  %v374_v48 = vld [vmem:[%s1991_s4 + $0x10] sm:$0xff] }
 0x109   :  { %458 = vmatpush.msrb.mxu0 %v366_v50  ;;  %1336 = vmatpush.msra.mxu2 %v366_v50  ;;  %v378_v50 = vld [vmem:[%s1991_s4 + $0x30] sm:$0xff] }
 0x10a   :  { %511 = vmatpush.msrb.mxu1 %v367_v52  ;;  %1352 = vmatpush.msra.mxu3 %v367_v52  ;;  %v380_v52 = vld [vmem:[%s1991_s4 + $0x40] sm:$0xff] }
 0x10b   :  { %459 = vmatpush.msrb.mxu0 %v364_v54  ;;  %1337 = vmatpush.msra.mxu2 %v364_v54  ;;  %v382_v54 = vld [vmem:[%s1991_s4 + $0x50] sm:$0xff] }
 0x10c   :  { %512 = vmatpush.msrb.mxu1 %v365_v56  ;;  %1353 = vmatpush.msra.mxu3 %v365_v56 }
 0x10d   :  { %460 = vmatpush.msrb.mxu0 %v362_v19  ;;  %1338 = vmatpush.msra.mxu2 %v362_v19 }
 0x10e   :  { %513 = vmatpush.msrb.mxu1 %v363_v20  ;;  %1354 = vmatpush.msra.mxu3 %v363_v20 }
 0x10f   :  { %461 = vmatpush.msrb.mxu0 %v360_v22  ;;  %1339 = vmatpush.msra.mxu2 %v360_v22 }
 0x110   :  { %514 = vmatpush.msrb.mxu1 %v361_v16  ;;  %1355 = vmatpush.msra.mxu3 %v361_v16 }
 0x111   :  { %462 = vmatpush.msrb.mxu0 %v358_v24  ;;  %1340 = vmatpush.msra.mxu2 %v358_v24 }
 0x112   :  { %515 = vmatpush.msrb.mxu1 %v359_v26  ;;  %1356 = vmatpush.msra.mxu3 %v359_v26  ;;  %v449_v26 = vpop.permute.xlu2 %448 }
 0x113   :  { %463 = vmatpush.msrb.mxu0 %v356_v27  ;;  %1341 = vmatpush.msra.mxu2 %v356_v27 }
 0x114   :  { %516 = vmatpush.msrb.mxu1 %v357_v28  ;;  %1357 = vmatpush.msra.mxu3 %v357_v28 }
 0x115   :  { %464 = vmatpush.msrb.mxu0 %v354_v29  ;;  %1342 = vmatpush.msra.mxu2 %v354_v29  ;;  %v439_v29 = vpop.permute.xlu1 %438 }
 0x116   :  { %517 = vmatpush.msrb.mxu1 %v355_v30  ;;  %1358 = vmatpush.msra.mxu3 %v355_v30  ;;  %v429_v30 = vpop.permute.xlu0 %428 }
 0x117   :  { %465 = vmatpush.msrb.mxu0 %v352_v31  ;;  %1343 = vmatpush.msra.mxu2 %v352_v31 }
 0x118   :  { %518 = vmatpush.msrb.mxu1 %v353_v32  ;;  %1359 = vmatpush.msra.mxu3 %v353_v32 }
 0x119   :  { %466 = vmatpush.msrb.mxu0 %v350_v34  ;;  %1344 = vmatpush.msra.mxu2 %v350_v34 }
 0x11a   :  { %519 = vmatpush.msrb.mxu1 %v351_v35  ;;  %1360 = vmatpush.msra.mxu3 %v351_v35  ;;  %v434_v10 = vpop.permute.xlu2 %433 }
 0x11b   :  { %467 = vmatpush.msrb.mxu0 %v348_v37  ;;  %1345 = vmatpush.msra.mxu2 %v348_v37 }
 0x11c   :  { %520 = vmatpush.msrb.mxu1 %v349_v39  ;;  %1361 = vmatpush.msra.mxu3 %v349_v39 }
 0x11d   :  { %468 = vmatpush.msrb.mxu0 %v346_v40  ;;  %1346 = vmatpush.msra.mxu2 %v346_v40  ;;  %v424_v39 = vpop.permute.xlu1 %423 }
 0x11e   :  { %521 = vmatpush.msrb.mxu1 %v347_v41  ;;  %1362 = vmatpush.msra.mxu3 %v347_v41 }
 0x11f   :  { %469 = vmatpush.msrb.mxu0 %v344_v62  ;;  %1347 = vmatpush.msra.mxu2 %v344_v62 }
 0x120   :  { %522 = vmatpush.msrb.mxu1 %v345_v63  ;;  %1363 = vmatpush.msra.mxu3 %v345_v63 }
 0x121   :  { %470 = vmatpush.msrb.mxu0 %v342_v44  ;;  %1348 = vmatpush.msra.mxu2 %v342_v44 }
 0x122   :  { %523 = vmatpush.msrb.mxu1 %v343_v60  ;;  %1364 = vmatpush.msra.mxu3 %v343_v60  ;;  %v419_v62 = vpop.permute.xlu2 %418  ;;  %v414_v60 = vpop.permute.xlu0 %413 }
 0x123   :  { %471 = vmatpush.msrb.mxu0 %v340_v61  ;;  %1349 = vmatpush.msra.mxu2 %v340_v61 }
 0x124   :  { %524 = vmatpush.msrb.mxu1 %v341_v45  ;;  %1365 = vmatpush.msra.mxu3 %v341_v45 }
 0x125   :  { %472 = vmatmul.f32.vlgmr.msrb.gmra.mxu0 %v372_v58  ;;  %481 = vmatmul.f32.vlgmr.msra.gmra.mxu2 %v375_v59 }
 0x126   :  { %525 = vmatmul.f32.vlgmr.msrb.gmra.mxu1 %v372_v58  ;;  %534 = vmatmul.f32.vlgmr.msra.gmra.mxu3 %v375_v59 }
 0x12d   :  { %475 = vmatmul.f32.gmra.mxu0 %v373_v46  ;;  %484 = vmatmul.f32.gmra.mxu2 %v376_v47 }
 0x12e   :  { %528 = vmatmul.f32.gmra.mxu1 %v373_v46  ;;  %537 = vmatmul.f32.gmra.mxu3 %v376_v47 }
 0x135   :  { %478 = vmatmul.f32.gmra.mxu0 %v374_v48  ;;  %487 = vmatmul.f32.gmra.mxu2 %v377_v49 }
 0x136   :  { %531 = vmatmul.f32.gmra.mxu1 %v374_v48  ;;  %540 = vmatmul.f32.gmra.mxu3 %v377_v49 }
 0x13d   :  { %490 = vmatmul.f32.gmra.mxu2 %v378_v50 }
 0x13e   :  { %543 = vmatmul.f32.gmra.mxu3 %v378_v50 }
 0x145   :  { %493 = vmatmul.f32.gmra.mxu2 %v379_v51 }
 0x146   :  { %546 = vmatmul.f32.gmra.mxu3 %v379_v51 }
 0x14d   :  { %496 = vmatmul.f32.gmra.mxu2 %v380_v52 }
 0x14e   :  { %549 = vmatmul.f32.gmra.mxu3 %v380_v52 }
 0x155   :  { %499 = vmatmul.f32.gmra.mxu2 %v381_v53 }
 0x156   :  { %552 = vmatmul.f32.gmra.mxu3 %v381_v53 }
 0x15d   :  { %502 = vmatmul.f32.gmra.mxu2 %v382_v54 }
 0x15e   :  { %555 = vmatmul.f32.gmra.mxu3 %v382_v54 }
 0x165   :  { %505 = vmatmul.f32.gmra.mxu2 %v383_v55 }
 0x166   :  { %558 = vmatmul.f32.gmra.mxu3 %v383_v55 }
 0x1a2   :  { %v1779_v28 = vpop.f32.mrf.mxu0 }
 0x1a3   :  { %v1781_v9 = vpop.f32.mrf.mxu1 }
 0x1a8   :  { %v1773_v56 = vpop.f32.mrf.mxu2 }
 0x1a9   :  { %v1775_v57 = vpop.f32.mrf.mxu3  ;;  %v483_v53 = vadd.f32 %v1773_v56, %v414_v60 }
 0x1aa   :  { %v476_v35 = vpop.f32.mrf.mxu0 }
 0x1ab   :  { %v529_v37 = vpop.f32.mrf.mxu1 }
 0x1b0   :  { %v485_v19 = vpop.f32.mrf.mxu2 }
 0x1b1   :  { %v1777_v17 = vpop.f32.mrf.mxu3  ;;  %v486_v48 = vadd.f32 %v485_v19, %v419_v62  ;;  %v404_v19 = vpop.permute.xlu2 %403 }
 0x1b2   :  { %v539_v50 = vadd.f32 %v1777_v17, %v419_v62  ;;  %v479_v51 = vpop.f32.mrf.mxu0  ;;  %v568_v17 = vmax.f32 %v483_v53, 0.0 }
 0x1b3   :  { %v532_v54 = vpop.f32.mrf.mxu1 }
 0x1b8   :  { %v488_v20 = vpop.f32.mrf.mxu2 }
 0x1b9   :  { %v541_v18 = vpop.f32.mrf.mxu3  ;;  %v489_v58 = vadd.f32 %v488_v20, %v424_v39  ;;  %v536_v20 = vadd.f32 %v1775_v57, %v414_v60 }
 0x1ba   :  { %v542_v46 = vadd.f32 %v541_v18, %v424_v39  ;;  %v570_v18 = vmax.f32 %v486_v48, 0.0 }
 0x1bb   :  { %v572_v55 = vmax.f32 %v489_v58, 0.0  ;;  %v569_v56 = vmax.f32 %v536_v20, 0.0 }
 0x1c0   :  { %v491_v21 = vpop.f32.mrf.mxu2 }
 0x1c1   :  { %v544_v22 = vpop.f32.mrf.mxu3  ;;  %v492_v43 = vadd.f32 %v491_v21, %v429_v30  ;;  %v409_v21 = vpop.permute.xlu1 %408 }
 0x1c2   :  { %v545_v61 = vadd.f32 %v544_v22, %v429_v30  ;;  %v573_v22 = vmax.f32 %v542_v46, 0.0 }
 0x1c3   :  { %v574_v49 = vmax.f32 %v492_v43, 0.0 }
 0x1c4   :  { %v575_v52 = vmax.f32 %v545_v61, 0.0 }
 0x1c8   :  { %v494_v15 = vpop.f32.mrf.mxu2 }
 0x1c9   :  { %v547_v16 = vpop.f32.mrf.mxu3  ;;  %v495_v1 = vadd.f32 %v494_v15, %v434_v10  ;;  %v480_v15 = vadd.f32 %v479_v51, %v409_v21 }
 0x1ca   :  { %v548_v42 = vadd.f32 %v547_v16, %v434_v10  ;;  %v571_v16 = vmax.f32 %v539_v50, 0.0  ;;  %v586_v10 = vld [vmem:[%s1993_s6] sm:$0xff] }
 0x1cb   :  { %v576_v59 = vmax.f32 %v495_v1, 0.0  ;;  %v640_v1 = vpop.permute.xlu1 %639 }
 0x1cc   :  { %v577_v47 = vmax.f32 %v548_v42, 0.0 }
 0x1d0   :  { %v497_v23 = vpop.f32.mrf.mxu2 }
 0x1d1   :  { %v550_v13 = vpop.f32.mrf.mxu3  ;;  %v498_v4 = vadd.f32 %v497_v23, %v439_v29  ;;  %v533_v23 = vadd.f32 %v532_v54, %v409_v21 }
 0x1d2   :  { %v551_v0 = vadd.f32 %v550_v13, %v439_v29  ;;  %v477_v13 = vadd.f32 %v476_v35, %v404_v19 }
 0x1d3   :  { %v578_v44 = vmax.f32 %v498_v4, 0.0  ;;  %v625_v43 = vpop.permute.xlu1 %624 }
 0x1d4   :  { %v579_v45 = vmax.f32 %v551_v0, 0.0 }
 0x1d8   :  { %v500_v24 = vpop.f32.mrf.mxu2 }
 0x1d9   :  { %v553_v14 = vpop.f32.mrf.mxu3  ;;  %v501_v34 = vadd.f32 %v500_v24, %v444_v11  ;;  %v399_v24 = vpop.permute.xlu0 %398 }
 0x1da   :  { %v554_v3 = vadd.f32 %v553_v14, %v444_v11  ;;  %v530_v14 = vadd.f32 %v529_v37, %v404_v19  ;;  %v527_v57 = vadd.f32 %v1781_v9, %v399_v24  ;;  %v567_v11 = vmax.f32 %v533_v23, 0.0  ;;  %v588_v9 = vld [vmem:[%s1993_s6 + $0x10] sm:$0xff] }
 0x1db   :  { %v580_v41 = vmax.f32 %v501_v34, 0.0 }
 0x1dc   :  { %v581_v63 = vmax.f32 %v554_v3, 0.0  ;;  %v563_v30 = vmax.f32 %v527_v57, 0.0 }
 0x1e0   :  { %v503_v27 = vpop.f32.mrf.mxu2 }
 0x1e1   :  { %v556_v12 = vpop.f32.mrf.mxu3  ;;  %v504_v31 = vadd.f32 %v503_v27, %v449_v26  ;;  %v564_v27 = vmax.f32 %v477_v13, 0.0 }
 0x1e2   :  { %v557_v33 = vadd.f32 %v556_v12, %v449_v26  ;;  %v566_v26 = vmax.f32 %v480_v15, 0.0  ;;  %v565_v12 = vmax.f32 %v530_v14, 0.0 }
 0x1e3   :  { %v582_v38 = vmax.f32 %v504_v31, 0.0  ;;  %v590_v31 = vld [vmem:[%s1993_s6 + $0x20] sm:$0xff] }
 0x1e4   :  { %v583_v40 = vmax.f32 %v557_v33, 0.0  ;;  %v593_v33 = vld [vmem:[%s1993_s6 + $0x38] sm:$0xff] }
 0x1e8   :  { %v506_v7 = vpop.f32.mrf.mxu2 }
 0x1e9   :  { %v507_v8 = vadd.f32 %v506_v7, %v454_v25  ;;  %v559_v32 = vpop.f32.mrf.mxu3  ;;  %v589_v7 = vld [vmem:[%s1993_s6 + $0x18] sm:$0xff] }
 0x1ea   :  { %v560_v5 = vadd.f32 %v559_v32, %v454_v25  ;;  %v474_v25 = vadd.f32 %v1779_v28, %v399_v24  ;;  %v587_v28 = vld [vmem:[%s1993_s6 + $0x8] sm:$0xff]  ;;  %v592_v32 = vld [vmem:[%s1993_s6 + $0x30] sm:$0xff] }
 0x1eb   :  { %v584_v6 = vmax.f32 %v507_v8, 0.0  ;;  %v591_v8 = vld [vmem:[%s1993_s6 + $0x28] sm:$0xff] }
 0x1ec   :  { %v585_v36 = vmax.f32 %v560_v5, 0.0  ;;  %v562_v29 = vmax.f32 %v474_v25, 0.0 }
 0x1ed   :  { %671 = vmatpush.msrb.mxu2 %v584_v6 }
 0x1ee   :  { %712 = vmatpush.msrb.mxu3 %v585_v36 }
 0x1ef   :  { %672 = vmatpush.msrb.mxu2 %v582_v38 }
 0x1f0   :  { %713 = vmatpush.msrb.mxu3 %v583_v40 }
 0x1f1   :  { %673 = vmatpush.msrb.mxu2 %v580_v41  ;;  %v635_v41 = vpop.permute.xlu2 %634 }
 0x1f2   :  { %714 = vmatpush.msrb.mxu3 %v581_v63  ;;  %v630_v63 = vpop.permute.xlu0 %629 }
 0x1f3   :  { %674 = vmatpush.msrb.mxu2 %v578_v44 }
 0x1f4   :  { %715 = vmatpush.msrb.mxu3 %v579_v45 }
 0x1f5   :  { %675 = vmatpush.msrb.mxu2 %v576_v59 }
 0x1f6   :  { %716 = vmatpush.msrb.mxu3 %v577_v47 }
 0x1f7   :  { %676 = vmatpush.msrb.mxu2 %v574_v49 }
 0x1f8   :  { %717 = vmatpush.msrb.mxu3 %v575_v52 }
 0x1f9   :  { %677 = vmatpush.msrb.mxu2 %v572_v55  ;;  %v620_v58 = vpop.permute.xlu2 %619 }
 0x1fa   :  { %718 = vmatpush.msrb.mxu3 %v573_v22  ;;  %v615_v20 = vpop.permute.xlu0 %614 }
 0x1fb   :  { %678 = vmatpush.msrb.mxu2 %v570_v18 }
 0x1fc   :  { %719 = vmatpush.msrb.mxu3 %v571_v16  ;;  %v610_v16 = vpop.permute.xlu1 %609 }
 0x1fd   :  { %679 = vmatpush.msrb.mxu2 %v568_v17 }
 0x1fe   :  { %720 = vmatpush.msrb.mxu3 %v569_v56 }
 0x1ff   :  { %680 = vmatpush.msrb.mxu2 %v566_v26 }
 0x200   :  { %721 = vmatpush.msrb.mxu3 %v567_v11 }
 0x201   :  { %681 = vmatpush.msrb.mxu2 %v564_v27  ;;  %v605_v56 = vpop.permute.xlu2 %604 }
 0x202   :  { %722 = vmatpush.msrb.mxu3 %v565_v12 }
 0x203   :  { %682 = vmatpush.msrb.mxu2 %v562_v29 }
 0x204   :  { %723 = vmatpush.msrb.mxu3 %v563_v30  ;;  %1311 = vmatmul.msk.f32.vlgmr.msrb.gmra.mxu2 %vm642_vm2, %v586_v10  ;;  %v765_v30 = vld [vmem:[%s1995_s8] sm:$0xf] }
 0x205   :  { %1319 = vmatmul.msk.f32.vlgmr.msrb.gmra.mxu3 %vm642_vm2, %v586_v10 }
 0x20c   :  { %1312 = vmatmul.msk.f32.gmra.mxu2 %vm642_vm2, %v587_v28 }
 0x20d   :  { %1320 = vmatmul.msk.f32.gmra.mxu3 %vm642_vm2, %v587_v28 }
 0x214   :  { %1313 = vmatmul.msk.f32.gmra.mxu2 %vm642_vm2, %v588_v9 }
 0x215   :  { %1321 = vmatmul.msk.f32.gmra.mxu3 %vm642_vm2, %v588_v9  ;;  %v770_v9 = vpop.permute.xlu0 %769 }
 0x21c   :  { %1314 = vmatmul.msk.f32.gmra.mxu2 %vm642_vm2, %v589_v7 }
 0x21d   :  { %1322 = vmatmul.msk.f32.gmra.mxu3 %vm642_vm2, %v589_v7 }
 0x224   :  { %1315 = vmatmul.msk.f32.gmra.mxu2 %vm642_vm2, %v590_v31 }
 0x225   :  { %1323 = vmatmul.msk.f32.gmra.mxu3 %vm642_vm2, %v590_v31 }
 0x22c   :  { %1316 = vmatmul.msk.f32.gmra.mxu2 %vm642_vm2, %v591_v8 }
 0x22d   :  { %1324 = vmatmul.msk.f32.gmra.mxu3 %vm642_vm2, %v591_v8 }
 0x234   :  { %1317 = vmatmul.msk.f32.gmra.mxu2 %vm642_vm2, %v592_v32 }
 0x235   :  { %1325 = vmatmul.msk.f32.gmra.mxu3 %vm642_vm2, %v592_v32 }
 0x23c   :  { %1318 = vmatmul.msk.f32.gmra.mxu2 %vm642_vm2, %v593_v33 }
 0x23d   :  { %1326 = vmatmul.msk.f32.gmra.mxu3 %vm642_vm2, %v593_v33 }
 0x287   :  { %v684_v5 = vpop.f32.mrf.mxu2 }
 0x288   :  { %v725_v34 = vpop.f32.mrf.mxu3  ;;  %v685_v26 = vadd.f32 %v684_v5, %v605_v56 }
 0x289   :  { %v726_v11 = vadd.f32 %v725_v34, %v605_v56 }
 0x28a   :  { %v749_v10 = vmax.f32 %v685_v26, 0.0 }
 0x28b   :  { %v750_v28 = vmax.f32 %v726_v11, 0.0 }
 0x28f   :  { %v687_v6 = vpop.f32.mrf.mxu2 }
 0x290   :  { %v728_v35 = vpop.f32.mrf.mxu3  ;;  %v688_v13 = vadd.f32 %v687_v6, %v610_v16 }
 0x291   :  { %v729_v14 = vadd.f32 %v728_v35, %v610_v16  ;;  %v1331_v16 = vrot.slane %v1490_v2, 9 }
 0x292   :  { %v751_v12 = vmax.f32 %v688_v13, 0.0 }
 0x293   :  { %v752_v29 = vmax.f32 %v729_v14, 0.0  ;;  %vm1861_vm12 = vcmp.lt.f32.partialorder %v1490_v2, %v1331_v16 }
 0x297   :  { %v690_v3 = vpop.f32.mrf.mxu2 }
 0x298   :  { %v731_v36 = vpop.f32.mrf.mxu3  ;;  %v691_v15 = vadd.f32 %v690_v3, %v615_v20 }
 0x299   :  { %v732_v23 = vadd.f32 %v731_v36, %v615_v20  ;;  %v862_v20 = vsub.f32 1.0, %v1490_v2 }
 0x29a   :  { %v753_v57 = vmax.f32 %v691_v15, 0.0 }
 0x29b   :  { %v754_v27 = vmax.f32 %v732_v23, 0.0  ;;  %v870_v23 = vsub.f32 0.0, %v1490_v2  ;;  %v865_v11 = vperm.slane %v862_v20, 4 }
 0x29f   :  { %v693_v37 = vpop.f32.mrf.mxu2 }
 0x2a0   :  { %v734_v4 = vpop.f32.mrf.mxu3  ;;  %v694_v55 = vadd.f32 %v693_v37, %v620_v58 }
 0x2a1   :  { %v735_v22 = vadd.f32 %v734_v4, %v620_v58  ;;  %v884_v58 = vperm.slane %v1490_v2, 1 }
 0x2a2   :  { %v755_v24 = vmax.f32 %v694_v55, 0.0  ;;  %v879_v55 = vperm.slane %v1490_v2, 4 }
 0x2a3   :  { %v756_v25 = vmax.f32 %v735_v22, 0.0 }
 0x2a7   :  { %v696_v38 = vpop.f32.mrf.mxu2 }
 0x2a8   :  { %v737_v39 = vpop.f32.mrf.mxu3  ;;  %v697_v51 = vadd.f32 %v696_v38, %v625_v43 }
 0x2a9   :  { %v738_v53 = vadd.f32 %v737_v39, %v625_v43 }
 0x2aa   :  { %v757_v19 = vmax.f32 %v697_v51, 0.0  ;;  %v898_v51 = vperm.slane %v1490_v2, 2 }
 0x2ab   :  { %v758_v17 = vmax.f32 %v738_v53, 0.0 }
 0x2af   :  { %v699_v0 = vpop.f32.mrf.mxu2 }
 0x2b0   :  { %v740_v40 = vpop.f32.mrf.mxu3  ;;  %v700_v47 = vadd.f32 %v699_v0, %v630_v63 }
 0x2b1   :  { %v741_v49 = vadd.f32 %v740_v40, %v630_v63 }
 0x2b2   :  { %v759_v21 = vmax.f32 %v700_v47, 0.0 }
 0x2b3   :  { %v760_v18 = vmax.f32 %v741_v49, 0.0 }
 0x2b7   :  { %v702_v62 = vpop.f32.mrf.mxu2 }
 0x2b8   :  { %v743_v42 = vpop.f32.mrf.mxu3  ;;  %v703_v60 = vadd.f32 %v702_v62, %v635_v41 }
 0x2b9   :  { %v744_v59 = vadd.f32 %v743_v42, %v635_v41 }
 0x2ba   :  { %v761_v52 = vmax.f32 %v703_v60, 0.0 }
 0x2bb   :  { %v762_v54 = vmax.f32 %v744_v59, 0.0  ;;  %v858_v59 = vpop.permute.xlu1 %857 }
 0x2bf   :  { %v705_v44 = vpop.f32.mrf.mxu2 }
 0x2c0   :  { %v706_v61 = vadd.f32 %v705_v44, %v640_v1  ;;  %v746_v45 = vpop.f32.mrf.mxu3 }
 0x2c1   :  { %v747_v46 = vadd.f32 %v746_v45, %v640_v1 }
 0x2c2   :  { %v763_v48 = vmax.f32 %v706_v61, 0.0 }
 0x2c3   :  { %v764_v50 = vmax.f32 %v747_v46, 0.0 }
 0x2c4   :  { %784 = vmatpush.msra.mxu0 %v763_v48  ;;  %v885_v48 = vperm.slane %v1490_v2, 5 }
 0x2c5   :  { %804 = vmatpush.msra.mxu1 %v764_v50 }
 0x2c6   :  { %785 = vmatpush.msra.mxu0 %v761_v52  ;;  %v899_v52 = vperm.slane %v1490_v2, 6  ;;  %v960_v26 = vperm.slane %v885_v48, 1 }
 0x2c7   :  { %805 = vmatpush.msra.mxu1 %v762_v54  ;;  %v878_v54 = vperm.slane %v1490_v2, 0 }
 0x2c8   :  { %786 = vmatpush.msra.mxu0 %v759_v21 }
 0x2c9   :  { %806 = vmatpush.msra.mxu1 %v760_v18 }
 0x2ca   :  { %787 = vmatpush.msra.mxu0 %v757_v19 }
 0x2cb   :  { %807 = vmatpush.msra.mxu1 %v758_v17 }
 0x2cc   :  { %788 = vmatpush.msra.mxu0 %v755_v24 }
 0x2cd   :  { %808 = vmatpush.msra.mxu1 %v756_v25  ;;  %v959_v25 = vperm.slane %v884_v58, 1 }
 0x2ce   :  { %789 = vmatpush.msra.mxu0 %v753_v57  ;;  %v864_v57 = vperm.slane %v862_v20, 0 }
 0x2cf   :  { %809 = vmatpush.msra.mxu1 %v754_v27 }
 0x2d0   :  { %790 = vmatpush.msra.mxu0 %v751_v12 }
 0x2d1   :  { %810 = vmatpush.msra.mxu1 %v752_v29  ;;  %v951_v29 = vld [vmem:[%s1988_s1 + $0x10] sm:$0xff] }
 0x2d2   :  { %791 = vmatpush.msra.mxu0 %v749_v10  ;;  %v952_v10 = vld [vmem:[%s1988_s1 + $0x18] sm:$0xff] }
 0x2d3   :  { %811 = vmatpush.msra.mxu1 %v750_v28  ;;  %1327 = vmatmul.msk.f32.vlgmr.msra.gmra.mxu0 %vm772_vm3, %v765_v30 }
 0x2d4   :  { %1328 = vmatmul.msk.f32.vlgmr.msra.gmra.mxu1 %vm772_vm3, %v765_v30 }
 0x350   :  { %v793_v7 = vpop.f32.mrf.mxu0 }
 0x351   :  { %v794_v31 = vadd.f32 %v793_v7, %v770_v9  ;;  %v813_v8 = vpop.f32.mrf.mxu1 }
 0x352   :  { %v814_v32 = vadd.f32 %v813_v8, %v770_v9  ;;  %v963_v8 = vperm.slane %v898_v51, 2 }
 0x353   :  { %v1329_v33 = vmul.f32 -1.442695, %v794_v31 }
 0x354   :  { %v1330_v5 = vmul.f32 -1.442695, %v814_v32  ;;  %v964_v32 = vperm.slane %v899_v52, 2 }
 0x355   :  { %1372 = vpow2.f32 %v1329_v33 }
 0x356   :  { %1374 = vpow2.f32 %v1330_v5 }
 0x35b   :  { %v1373_v34 = vpop.eup %1372 }
 0x35c   :  { %v1375_v6 = vpop.eup %1374  ;;  %v822_v35 = vadd.f32 1.0, %v1373_v34  ;;  %v1865_v34 = vsub.f32 %v951_v29, %v959_v25 }
 0x35d   :  { %v823_v3 = vadd.f32 1.0, %v1375_v6  ;;  %v1867_v6 = vsub.f32 %v952_v10, %v960_v26 }
 0x35e   :  { %1376 = vrcp.f32 %v822_v35  ;;  %v835_v0 = vand.u32 2147483648, %v822_v35  ;;  %v833_v41 = vand.u32 2147483647, %v822_v35  ;;  %vm829_vm6 = vweird.f32 %v822_v35 }
 0x35f   :  { %1378 = vrcp.f32 %v823_v3  ;;  %v850_v62 = vand.u32 2147483648, %v823_v3  ;;  %v848_v63 = vand.u32 2147483647, %v823_v3  ;;  %vm844_vm8 = vweird.f32 %v823_v3 }
 0x360   :  { %v836_v44 = vor.u32 1.1754944e-38, %v835_v0  ;;  %vm834_vm9 = vcmp.eq.f32.partialorder %v833_v41, 8.507059e+37  ;;  %v872_v41 = vperm.slane %v870_v23, 0 }
 0x361   :  { %v851_v45 = vor.u32 1.1754944e-38, %v850_v62  ;;  %vm849_vm11 = vcmp.eq.f32.partialorder %v848_v63, 8.507059e+37  ;;  %v873_v62 = vperm.slane %v870_v23, 4 }
 0x364   :  { %v1377_v36 = vpop.eup %1376 }
 0x365   :  { %v1379_v37 = vpop.eup %1378  ;;  %v825_v4 = vmul.f32 %v1377_v36, %v822_v35  ;;  %vm830_vm4 = vweird.f32 %v1377_v36 }
 0x366   :  { %v840_v38 = vmul.f32 %v1379_v37, %v823_v3  ;;  %vm845_vm5 = vweird.f32 %v1379_v37  ;;  %vm831_vm7 = vmor %vm829_vm6, %vm830_vm4 }
 0x367   :  { %v826_v39 = vsub.f32 1.0, %v825_v4  ;;  %vm846_vm10 = vmor %vm844_vm8, %vm845_vm5 }
 0x368   :  { %v841_v40 = vsub.f32 1.0, %v840_v38 }
 0x369   :  { %v827_v1 = vmul.f32 %v1377_v36, %v826_v39 }
 0x36a   :  { %v842_v42 = vmul.f32 %v1379_v37, %v841_v40  ;;  %v953_v40 = vld [vmem:[%s1988_s1 + $0x20] sm:$0xff] }
 0x36b   :  { %v828_v43 = vadd.f32 %v1377_v36, %v827_v1  ;;  %v954_v1 = vld [vmem:[%s1988_s1 + $0x28] sm:$0xff] }
 0x36c   :  { %v843_v60 = vadd.f32 %v1379_v37, %v842_v42 }
 0x36d   :  { %v832_v61 = vsel %vm831_vm7, %v1377_v36, %v828_v43 }
 0x36e   :  { %v837_v46 = vsel %vm834_vm9, %v836_v44, %v832_v61  ;;  %v847_v47 = vsel %vm846_vm10, %v1379_v37, %v843_v60 }
 0x36f   :  { %v1833_v49 = vmul.f32 %v858_v59, %v837_v46  ;;  %v852_v50 = vsel %vm849_vm11, %v851_v45, %v847_v47  ;;  %v990_v47 = vmul.f32 %v1865_v34, %v1865_v34 }
 0x370   :  { %v1837_v53 = vmul.f32 %v858_v59, %v852_v50  ;;  %v1883_v59 = vsub.f32 %v954_v1, %v964_v32 }
 0x371   :  { %v888_v21 = vmul.f32 %v884_v58, %v1833_v49  ;;  %v902_v15 = vmul.f32 %v898_v51, %v1833_v49  ;;  %v882_v17 = vmul.f32 %v878_v54, %v1833_v49  ;;  %v1881_v58 = vsub.f32 %v953_v40, %v963_v8 }
 0x372   :  { %v889_v22 = vmul.f32 %v885_v48, %v1837_v53  ;;  %v903_v19 = vmul.f32 %v899_v52, %v1837_v53  ;;  %v883_v13 = vmul.f32 %v879_v55, %v1837_v53  ;;  %v991_v48 = vmul.f32 %v1867_v6, %v1867_v6 }
 0x373   :  { %v892_v18 = vrot.slane %v888_v21, 1  ;;  %v906_v56 = vrot.slane %v902_v15, 1  ;;  %v992_v52 = vmul.f32 %v1881_v58, %v1881_v58  ;;  %v1896_v20 = vmul.f32 %v864_v57, %v1833_v49 }
 0x374   :  { %v893_v24 = vrot.slane %v889_v22, 1  ;;  %v907_v14 = vrot.slane %v903_v19, 1  ;;  %v1905_v15 = vmul.f32 %v873_v62, %v1837_v53 }
 0x375   :  { %v896_v27 = vsub.f32 %v882_v17, %v892_v18  ;;  %v910_v30 = vsub.f32 %v888_v21, %v906_v56  ;;  %v993_v21 = vmul.f32 %v1883_v59, %v1883_v59  ;;  %v1902_v18 = vmul.f32 %v872_v41, %v1833_v49 }
 0x376   :  { %v897_v12 = vsub.f32 %v883_v13, %v893_v24  ;;  %v911_v28 = vsub.f32 %v889_v22, %v907_v14  ;;  %v1899_v22 = vmul.f32 %v865_v11, %v1837_v53  ;;  %v994_v16 = vadd.f32 %v992_v52, %v990_v47 }
 0x377   :  { %v916_v35 = vmin.f32 %v896_v27, 0.0  ;;  %v918_v3 = vmax.f32 %v896_v27, 0.0  ;;  %v934_v4 = vmin.f32 %v910_v30, 0.0  ;;  %v936_v38 = vmax.f32 %v910_v30, 0.0 }
 0x378   :  { %v917_v7 = vmin.f32 %v897_v12, 0.0  ;;  %v919_v31 = vmax.f32 %v897_v12, 0.0  ;;  %v935_v33 = vmin.f32 %v911_v28, 0.0  ;;  %v937_v5 = vmax.f32 %v911_v28, 0.0 }
 0x379   :  { %v995_v23 = vadd.f32 %v993_v21, %v991_v48  ;;  %v1139_v24 = vmul.f32 %v1896_v20, %v1896_v20  ;;  %v1140_v56 = vmul.f32 %v1899_v22, %v1899_v22  ;;  %v1175_v14 = vmul.f32 %v1902_v18, %v1902_v18 }
 0x37a   :  { %v922_v36 = vrot.slane %v917_v7, 4  ;;  %v929_v37 = vrot.slane %v919_v31, 4  ;;  %v940_v39 = vrot.slane %v935_v33, 4  ;;  %v945_v0 = vrot.slane %v937_v5, 4 }
 0x37b   :  { %v1176_v25 = vmul.f32 %v1905_v15, %v1905_v15 }
 0x37c   :  { %v924_v42 = vsel %vm923_vm13, %v916_v35, %v922_v36  ;;  %v930_v63 = vsel %vm923_vm13, %v918_v3, %v929_v37  ;;  %v941_v60 = vsel %vm923_vm13, %v934_v4, %v940_v39  ;;  %v946_v61 = vsel %vm923_vm13, %v936_v38, %v945_v0 }
 0x37d   :  { %v925_v43 = vrot.slane %v924_v42, 7  ;;  %v931_v44 = vrot.slane %v930_v63, 7  ;;  %v948_v45 = vsel %vm1861_vm12, %v941_v60, %v946_v61 }
 0x37e   :  { %v968_v51 = vmul.f32 %v948_v45, %v948_v45  ;;  %v1927_v32 = vperm.slane %v948_v45, 1  ;;  %v1929_v5 = vperm.slane %v948_v45, 5 }
 0x37f   :  { %v933_v46 = vsel %vm1861_vm12, %v925_v43, %v931_v44 }
 0x380   :  { %v967_v50 = vmul.f32 %v933_v46, %v933_v46  ;;  %v1923_v7 = vperm.slane %v933_v46, 1  ;;  %v1925_v31 = vperm.slane %v933_v46, 5  ;;  %v984_v38 = vperm.slane %v1927_v32, 1 }
 0x381   :  { %v985_v0 = vperm.slane %v1929_v5, 1 }
 0x382   :  { %v969_v19 = vadd.f32 %v968_v51, %v967_v50  ;;  %v975_v3 = vperm.slane %v1923_v7, 1  ;;  %v976_v37 = vperm.slane %v1925_v31, 1  ;;  %v986_v63 = vmul.f32 %v984_v38, %v1881_v58 }
 0x383   :  { %v987_v44 = vmul.f32 %v985_v0, %v1883_v59  ;;  %v956_v38 = vperm.slane %v879_v55, 0  ;;  %v950_v0 = vld [vmem:[%s1988_s1 + $0x8] sm:$0xff] }
 0x384   :  { %v997_v17 = vperm.slane %v969_v19, 1  ;;  %v998_v13 = vperm.slane %v969_v19, 5  ;;  %v977_v1 = vmul.f32 %v975_v3, %v1865_v34  ;;  %v978_v62 = vmul.f32 %v976_v37, %v1867_v6 }
 0x385   :  { %v955_v37 = vperm.slane %v878_v54, 0  ;;  %v958_v54 = vsub.f32 %v950_v0, %v956_v38 }
 0x386   :  { %v1001_v26 = vperm.slane %v997_v17, 1  ;;  %v1002_v57 = vperm.slane %v998_v13, 1  ;;  %v1915_v11 = vadd.f32 %v1139_v24, %v997_v17  ;;  %v1917_v27 = vadd.f32 %v1140_v56, %v998_v13 }
 0x387   :  { %v1919_v12 = vadd.f32 %v1175_v14, %v997_v17  ;;  %v1921_v29 = vadd.f32 %v1176_v25, %v998_v13  ;;  %v988_v61 = vadd.f32 %v986_v63, %v977_v1  ;;  %v989_v46 = vadd.f32 %v987_v44, %v978_v62 }
 0x388   :  { %v1003_v10 = vmul.f32 %v1001_v26, %v994_v16  ;;  %v1004_v30 = vmul.f32 %v1002_v57, %v995_v23  ;;  %v1029_v17 = vlaneseq }
 0x38a   :  { %v1005_v28 = vmax.f32 %v1003_v10, 1e-16  ;;  %v1006_v9 = vmax.f32 %v1004_v30, 1e-16  ;;  %v1030_v25 = vshrl.u32 %v1029_v17, 7 }
 0x38c   :  { %1380 = vrsqrt.f32 %v1005_v28  ;;  %vm1013_vm1 = vweird.f32 %v1005_v28  ;;  %vm1023_vm3 = vweird.f32 %v1006_v9 }
 0x38d   :  { %1382 = vrsqrt.f32 %v1006_v9 }
 0x392   :  { %v1381_v8 = vpop.eup %1380 }
 0x393   :  { %v1383_v33 = vpop.eup %1382  ;;  %v1008_v35 = vmul.f32 %v1381_v8, %v1005_v28  ;;  %vm1014_vm14 = vweird.f32 %v1381_v8 }
 0x394   :  { %v1018_v36 = vmul.f32 %v1383_v33, %v1006_v9  ;;  %vm1024_vm15 = vweird.f32 %v1383_v33  ;;  %vm1015_vm2 = vmor %vm1013_vm1, %vm1014_vm14 }
 0x395   :  { %v1009_v4 = vmul.f32 %v1381_v8, %v1008_v35  ;;  %vm1025_vm4 = vmor %vm1023_vm3, %vm1024_vm15 }
 0x396   :  { %v1019_v39 = vmul.f32 %v1383_v33, %v1018_v36 }
 0x397   :  { %v1010_v40 = vmul.f32 0.5, %v1009_v4  ;;  %v949_v4 = vld [vmem:[%s1988_s1] sm:$0xff]  ;;  %s1420_s1 = smov [#allocation2]  }
 0x398   :  { %v1020_v41 = vmul.f32 0.5, %v1019_v39  ;;  %v957_v62 = vsub.f32 %v949_v4, %v955_v37  ;;  %s1266_s19 = sshll.u32 %s1420_s1, 4  ;;  %s1267_s19 = int_to_ptr.vmem [resolvable:$true] %s1266_s19 }
 0x399   :  { %v1011_v42 = vsub.f32 1.5, %v1010_v40 }
 0x39a   :  { %v1021_v43 = vsub.f32 1.5, %v1020_v41 }
 0x39b   :  { %v1012_v60 = vmul.f32 %v1381_v8, %v1011_v42 }
 0x39c   :  { %v1022_v45 = vmul.f32 %v1383_v33, %v1021_v43  ;;  %v1419_v43 = vmov 0.0  }
 0x39d   :  { %v1016_v47 = vsel %vm1015_vm2, %v1381_v8, %v1012_v60 }
 0x39e   :  { %v1026_v48 = vsel %vm1025_vm4, %v1383_v33, %v1022_v45  ;;  %v1027_v50 = vmul.f32 %v1016_v47, %v988_v61 }
 0x39f   :  { %v1028_v51 = vmul.f32 %v1026_v48, %v989_v46 }
 0x3a0   :  { %v1031_v52 = vrot.slane %v1027_v50, 4 }
 0x3a1   :  { %v1037_v21 = vrot.slane %v1028_v51, 4 }
 0x3a2   :  { %v1032_v19 = vmax.f32 %v1027_v50, %v1031_v52 }
 0x3a3   :  { %v1038_v16 = vmax.f32 %v1028_v51, %v1037_v21 }
 0x3a4   :  { %v1033_v23 = vrot.slane %v1032_v19, 2 }
 0x3a5   :  { %v1039_v13 = vrot.slane %v1038_v16, 2 }
 0x3a6   :  { %v1034_v24 = vmax.f32 %v1032_v19, %v1033_v23 }
 0x3a7   :  { %v1040_v56 = vmax.f32 %v1038_v16, %v1039_v13 }
 0x3a8   :  { %v1035_v14 = vrot.slane %v1034_v24, 1 }
 0x3a9   :  { %v1041_v26 = vrot.slane %v1040_v56, 1 }
 0x3aa   :  { %v1036_v57 = vmax.f32 %v1034_v24, %v1035_v14 }
 0x3ab   :  { %v1042_v10 = vmax.f32 %v1040_v56, %v1041_v26 }
 0x3ac   :  { %vm1043_vm5 = vcmp.ge.f32.partialorder %v1027_v50, %v1036_v57 }
 0x3ad   :  { %vm1044_vm6 = vcmp.ge.f32.partialorder %v1028_v51, %v1042_v10  ;;  %v1045_v30 = vsel %vm1043_vm5, %v1030_v25, 8 }
 0x3ae   :  { %v1046_v28 = vsel %vm1044_vm6, %v1030_v25, 8  ;;  %v1047_v9 = vrot.slane %v1045_v30, 4 }
 0x3af   :  { %v1056_v8 = vrot.slane %v1046_v28, 4 }
 0x3b0   :  { %vm1048_vm7 = vcmp.lt.s32.totalorder %v1045_v30, %v1047_v9 }
 0x3b1   :  { %v1049_v33 = vsel %vm1048_vm7, %v1045_v30, %v1047_v9  ;;  %vm1057_vm8 = vcmp.lt.s32.totalorder %v1046_v28, %v1056_v8 }
 0x3b2   :  { %v1050_v35 = vrot.slane %v1049_v33, 2  ;;  %v1058_v3 = vsel %vm1057_vm8, %v1046_v28, %v1056_v8 }
 0x3b3   :  { %v1059_v36 = vrot.slane %v1058_v3, 2 }
 0x3b4   :  { %vm1051_vm9 = vcmp.lt.s32.totalorder %v1049_v33, %v1050_v35 }
 0x3b5   :  { %v1052_v39 = vsel %vm1051_vm9, %v1049_v33, %v1050_v35  ;;  %vm1060_vm10 = vcmp.lt.s32.totalorder %v1058_v3, %v1059_v36 }
 0x3b6   :  { %v1053_v40 = vrot.slane %v1052_v39, 1  ;;  %v1061_v1 = vsel %vm1060_vm10, %v1058_v3, %v1059_v36 }
 0x3b7   :  { %v1062_v41 = vrot.slane %v1061_v1, 1 }
 0x3b8   :  { %vm1054_vm11 = vcmp.lt.s32.totalorder %v1052_v39, %v1053_v40 }
 0x3b9   :  { %v1055_v42 = vsel %vm1054_vm11, %v1052_v39, %v1053_v40  ;;  %vm1063_vm12 = vcmp.lt.s32.totalorder %v1061_v1, %v1062_v41 }
 0x3ba   :  { %v1064_v63 = vsel %vm1063_vm12, %v1061_v1, %v1062_v41  ;;  %vm1065_vm13 = vcmp.eq.s32.totalorder %v1030_v25, %v1055_v42 }
 0x3bb   :  { %vm1066_vm14 = vcmp.eq.s32.totalorder %v1030_v25, %v1064_v63  ;;  %v1332_v2 = vsel %vm1065_vm13, 1.0, %v1419_v43  ;;  %vm1248_vm13 = vcmask 1040384  }
 0x3bc   :  { %v1333_v55 = vsel %vm1066_vm14, 1.0, %v1419_v43  ;;  %v1071_v44 = vmul.f32 %v1332_v2, %v957_v62  ;;  %v1085_v60 = vmul.f32 %v1332_v2, %v1865_v34  ;;  %v1099_v61 = vmul.f32 %v1332_v2, %v1881_v58 }
 0x3bd   :  { %v1072_v45 = vmul.f32 %v1333_v55, %v958_v54  ;;  %v1086_v46 = vmul.f32 %v1333_v55, %v1867_v6  ;;  %v1100_v47 = vmul.f32 %v1333_v55, %v1883_v59 }
 0x3be   :  { %v1073_v48 = vrot.slane %v1071_v44, 4  ;;  %v1087_v50 = vrot.slane %v1085_v60, 4  ;;  %v1101_v51 = vrot.slane %v1099_v61, 4 }
 0x3bf   :  { %v1079_v52 = vrot.slane %v1072_v45, 4  ;;  %v1093_v21 = vrot.slane %v1086_v46, 4  ;;  %v1107_v19 = vrot.slane %v1100_v47, 4 }
 0x3c0   :  { %v1074_v16 = vadd.f32 %v1073_v48, %v1071_v44  ;;  %v1088_v23 = vadd.f32 %v1087_v50, %v1085_v60  ;;  %v1102_v17 = vadd.f32 %v1101_v51, %v1099_v61 }
 0x3c1   :  { %v1080_v13 = vadd.f32 %v1079_v52, %v1072_v45  ;;  %v1094_v24 = vadd.f32 %v1093_v21, %v1086_v46  ;;  %v1108_v56 = vadd.f32 %v1107_v19, %v1100_v47 }
 0x3c2   :  { %v1075_v34 = vrot.slane %v1074_v16, 2  ;;  %v1089_v14 = vrot.slane %v1088_v23, 2  ;;  %v1103_v58 = vrot.slane %v1102_v17, 2 }
 0x3c3   :  { %v1081_v25 = vrot.slane %v1080_v13, 2  ;;  %v1095_v26 = vrot.slane %v1094_v24, 2  ;;  %v1109_v6 = vrot.slane %v1108_v56, 2 }
 0x3c4   :  { %v1076_v57 = vadd.f32 %v1075_v34, %v1074_v16  ;;  %v1090_v59 = vadd.f32 %v1089_v14, %v1088_v23  ;;  %v1104_v10 = vadd.f32 %v1103_v58, %v1102_v17 }
 0x3c5   :  { %v1082_v30 = vadd.f32 %v1081_v25, %v1080_v13  ;;  %v1096_v28 = vadd.f32 %v1095_v26, %v1094_v24  ;;  %v1110_v9 = vadd.f32 %v1109_v6, %v1108_v56 }
 0x3c6   :  { %v1077_v8 = vrot.slane %v1076_v57, 1  ;;  %v1091_v33 = vrot.slane %v1090_v59, 1  ;;  %v1105_v35 = vrot.slane %v1104_v10, 1 }
 0x3c7   :  { %v1083_v3 = vrot.slane %v1082_v30, 1  ;;  %v1097_v36 = vrot.slane %v1096_v28, 1  ;;  %v1111_v37 = vrot.slane %v1110_v9, 1 }
 0x3c8   :  { %v1078_v4 = vadd.f32 %v1077_v8, %v1076_v57  ;;  %v1092_v38 = vadd.f32 %v1091_v33, %v1090_v59  ;;  %v1106_v39 = vadd.f32 %v1105_v35, %v1104_v10 }
 0x3c9   :  { %v1084_v0 = vadd.f32 %v1083_v3, %v1082_v30  ;;  %v1098_v40 = vadd.f32 %v1097_v36, %v1096_v28  ;;  %v1112_v1 = vadd.f32 %v1111_v37, %v1110_v9 }
 0x3ca   :  { %v1113_v41 = vmul.f32 %v1078_v4, %v1078_v4  ;;  %v1115_v62 = vmul.f32 %v1092_v38, %v1092_v38  ;;  %v1119_v43 = vmul.f32 %v1106_v39, %v1106_v39  ;;  %v1129_v55 = vmul.f32 %v1078_v4, %v1896_v20 }
 0x3cb   :  { %v1114_v54 = vmul.f32 %v1084_v0, %v1084_v0  ;;  %v1116_v42 = vmul.f32 %v1098_v40, %v1098_v40  ;;  %v1120_v2 = vmul.f32 %v1112_v1, %v1112_v1  ;;  %v1130_v60 = vmul.f32 %v1084_v0, %v1899_v22 }
 0x3cc   :  { %v1117_v63 = vadd.f32 %v1115_v62, %v1113_v41  ;;  %v1171_v61 = vmul.f32 %v1078_v4, %v1902_v18  ;;  %v1957_v45 = vmul.f32 %v1084_v0, %v1905_v15  ;;  %v1123_v17 = vmul.f32 %v1092_v38, %v1923_v7 }
 0x3cd   :  { %v1118_v44 = vadd.f32 %v1116_v42, %v1114_v54  ;;  %v1125_v13 = vmul.f32 %v1106_v39, %v1927_v32  ;;  %v1124_v24 = vmul.f32 %v1098_v40, %v1925_v31 }
 0x3ce   :  { %v1121_v46 = vadd.f32 %v1119_v43, %v1117_v63 }
 0x3cf   :  { %v1122_v47 = vadd.f32 %v1120_v2, %v1118_v44 }
 0x3d0   :  { %v1143_v48 = vmul.f32 %v1915_v11, %v1121_v46  ;;  %v1179_v50 = vmul.f32 %v1919_v12, %v1121_v46  ;;  %v1126_v11 = vmul.f32 %v1112_v1, %v1929_v5  ;;  %v1127_v12 = vadd.f32 %v1125_v13, %v1123_v17 }
 0x3d1   :  { %v1144_v51 = vmul.f32 %v1917_v27, %v1122_v47  ;;  %v1180_v52 = vmul.f32 %v1921_v29, %v1122_v47  ;;  %v1238_v17 = vrot.slane %v1833_v49, 5  ;;  %v1250_v49 = vsel %vm1248_vm13, %v1925_v31, %v1929_v5 }
 0x3d2   :  { %v1145_v21 = vmax.f32 %v1143_v48, 1e-16  ;;  %v1181_v16 = vmax.f32 %v1179_v50, 1e-16  ;;  %v1128_v56 = vadd.f32 %v1126_v11, %v1124_v24  ;;  %v1133_v26 = vrot.slane %v1127_v12, 5 }
 0x3d3   :  { %v1146_v19 = vmax.f32 %v1144_v51, 1e-16  ;;  %v1182_v23 = vmax.f32 %v1180_v52, 1e-16  ;;  %v1249_v11 = vsel %vm1248_vm13, %v1923_v7, %v1927_v32 }
 0x3d4   :  { %1384 = vrsqrt.f32 %v1145_v21  ;;  %v1134_v59 = vrot.slane %v1128_v56, 5  ;;  %v1137_v35 = vadd.f32 %v1133_v26, %v1129_v55  ;;  %vm1153_vm2 = vweird.f32 %v1145_v21 }
 0x3d5   :  { %1386 = vrsqrt.f32 %v1146_v19  ;;  %vm1163_vm5 = vweird.f32 %v1146_v19  ;;  %v1173_v62 = vadd.f32 %v1171_v61, %v1133_v26  ;;  %vm1189_vm8 = vweird.f32 %v1181_v16 }
 0x3d6   :  { %1388 = vrsqrt.f32 %v1181_v16  ;;  %v1138_v37 = vadd.f32 %v1134_v59, %v1130_v60  ;;  %vm1199_vm10 = vweird.f32 %v1182_v23  ;;  %v1174_v55 = vadd.f32 %v1957_v45, %v1134_v59 }
 0x3d7   :  { %1390 = vrsqrt.f32 %v1182_v23 }
 0x3da   :  { %v1385_v27 = vpop.eup %1384 }
 0x3db   :  { %v1387_v29 = vpop.eup %1386  ;;  %v1148_v34 = vmul.f32 %v1385_v27, %v1145_v21  ;;  %vm1154_vm15 = vweird.f32 %v1385_v27 }
 0x3dc   :  { %v1389_v14 = vpop.eup %1388  ;;  %v1158_v58 = vmul.f32 %v1387_v29, %v1146_v19  ;;  %vm1164_vm1 = vweird.f32 %v1387_v29  ;;  %vm1155_vm4 = vmor %vm1153_vm2, %vm1154_vm15  ;;  %vm1251_vm15 = vcmask 1041408  }
 0x3dd   :  { %v1391_v25 = vpop.eup %1390  ;;  %v1149_v6 = vmul.f32 %v1385_v27, %v1148_v34  ;;  %v1184_v57 = vmul.f32 %v1389_v14, %v1181_v16  ;;  %vm1190_vm3 = vweird.f32 %v1389_v14  ;;  %vm1165_vm7 = vmor %vm1163_vm5, %vm1164_vm1  ;;  %vm1256_vm1 = vcmask 1046528  }
 0x3de   :  { %v1159_v10 = vmul.f32 %v1387_v29, %v1158_v58  ;;  %v1194_v30 = vmul.f32 %v1391_v25, %v1182_v23  ;;  %vm1200_vm6 = vweird.f32 %v1391_v25  ;;  %vm1191_vm9 = vmor %vm1189_vm8, %vm1190_vm3 }
 0x3df   :  { %v1150_v28 = vmul.f32 0.5, %v1149_v6  ;;  %v1185_v9 = vmul.f32 %v1389_v14, %v1184_v57  ;;  %vm1201_vm11 = vmor %vm1199_vm10, %vm1200_vm6 }
 0x3e0   :  { %v1160_v8 = vmul.f32 0.5, %v1159_v10  ;;  %v1195_v33 = vmul.f32 %v1391_v25, %v1194_v30 }
 0x3e1   :  { %v1151_v3 = vsub.f32 1.5, %v1150_v28  ;;  %v1186_v36 = vmul.f32 0.5, %v1185_v9 }
 0x3e2   :  { %v1161_v4 = vsub.f32 1.5, %v1160_v8  ;;  %v1196_v38 = vmul.f32 0.5, %v1195_v33 }
 0x3e3   :  { %v1152_v39 = vmul.f32 %v1385_v27, %v1151_v3  ;;  %v1187_v0 = vsub.f32 1.5, %v1186_v36 }
 0x3e4   :  { %v1162_v40 = vmul.f32 %v1387_v29, %v1161_v4  ;;  %v1197_v1 = vsub.f32 1.5, %v1196_v38 }
 0x3e5   :  { %v1156_v41 = vsel %vm1155_vm4, %v1385_v27, %v1152_v39  ;;  %v1188_v54 = vmul.f32 %v1389_v14, %v1187_v0 }
 0x3e6   :  { %v1166_v42 = vsel %vm1165_vm7, %v1387_v29, %v1162_v40  ;;  %v1167_v63 = vmul.f32 %v1156_v41, %v1137_v35  ;;  %v1198_v43 = vmul.f32 %v1391_v25, %v1197_v1 }
 0x3e7   :  { %v1168_v2 = vmul.f32 %v1166_v42, %v1138_v37  ;;  %v1192_v44 = vsel %vm1191_vm9, %v1389_v14, %v1188_v54 }
 0x3e8   :  { %v1169_v60 = vsub.f32 1.0, %v1167_v63  ;;  %v1202_v46 = vsel %vm1201_vm11, %v1391_v25, %v1198_v43  ;;  %v1203_v47 = vmul.f32 %v1192_v44, %v1173_v62 }
 0x3e9   :  { %v1170_v48 = vsub.f32 1.0, %v1168_v2  ;;  %v1204_v50 = vmul.f32 %v1202_v46, %v1174_v55 }
 0x3ea   :  { %v1205_v51 = vsub.f32 1.0, %v1203_v47 }
 0x3eb   :  { %v1206_v52 = vsub.f32 1.0, %v1204_v50 }
 0x3ec   :  { %vm1207_vm12 = vcmp.le.f32.partialorder %v1169_v60, %v1205_v51  ;;  %v1211_v61 = vadd.f32 %v1205_v51, %v1169_v60 }
 0x3ed   :  { %vm1208_vm14 = vcmp.le.f32.partialorder %v1170_v48, %v1206_v52  ;;  %v1209_v21 = vsel %vm1207_vm12, %v1896_v20, %v1902_v18  ;;  %v1212_v19 = vadd.f32 %v1206_v52, %v1170_v48  ;;  %v1239_v20 = vrot.slane %v1837_v53, 5 }
 0x3ee   :  { %v1210_v45 = vsel %vm1208_vm14, %v1899_v22, %v1905_v15  ;;  %v1213_v16 = vmul.f32 0.5, %v1211_v61  ;;  %v1232_v23 = vrot.slane %v1209_v21, 1 }
 0x3ef   :  { %v1214_v13 = vmul.f32 0.5, %v1212_v19  ;;  %v1233_v24 = vrot.slane %v1210_v45, 1 }
 0x3f0   :  { %v1244_v22 = vrot.slane %v1213_v16, 4  ;;  %v1252_v18 = vsel %vm1251_vm15, %v1249_v11, %v1232_v23 }
 0x3f1   :  { %v1245_v15 = vrot.slane %v1214_v13, 4  ;;  %v1253_v12 = vsel %vm1251_vm15, %v1250_v49, %v1233_v24  ;;  %v1254_v7 = vsel %vm205_vm0, %v1252_v18, %v1238_v17 }
 0x3f2   :  { %v1255_v32 = vsel %vm205_vm0, %v1253_v12, %v1239_v20  ;;  %v1257_v27 = vsel %vm1256_vm1, %v1254_v7, %v1244_v22 }
 0x3f3   :  { %v1258_v56 = vsel %vm1256_vm1, %v1255_v32, %v1245_v15  ;;  %1259 = vst [vmem:[#allocation2] sm:$0xff] %v1257_v27 }
 0x3f4   :  { %1260 = vst [vmem:[#allocation2 + $0x8] sm:$0xff] %v1258_v56 }
 0x3f5   :  { %1271 = dma.vmem_to_hbm [thread:$0]  %s1267_s19, 256, %s1269_s7, [#allocation3]  }
 0x3f6   :  { %1416 = dma.done.wait [#allocation3], 256  }
 0x3f7   :  { %1417 = vsyncadd [#allocation3], 4294967040 }
 0x3f8   :  { %1276 = vsyncpa [#allocation3], 1 }

</bundles_post_ra>
